<compile_context>
chip_gen: v5e
topology: v5e:2x2
jax: 0.10.0
libtpu: 0.0.40
codegen_flags: <defaults>
</compile_context>

<pallas_src>
import functools
import math

import jax
import jax.numpy as jnp
from jax.experimental import pallas as pl
from jax.experimental.pallas import tpu as pltpu


# ---------------------------------------------------------------------------
# In-kernel helpers
# ---------------------------------------------------------------------------

def _layer_norm(x, gamma, beta, eps, approx_recip):
    """Matches the PyTorch module: gamma*(x-mean)/(std_unbiased + eps) + beta.

    The divide is replaced by a per-row reciprocal (EUP slot) * broadcast multiply.
    """
    n = x.shape[-1]
    mean = jnp.mean(x, axis=-1, keepdims=True)
    centered = x - mean
    var = jnp.sum(centered * centered, axis=-1, keepdims=True) * (1.0 / (n - 1))
    std = jnp.sqrt(var)
    inv = pl.reciprocal(std + eps, approx=approx_recip)   # (M, 1)
    return centered * inv * gamma + beta


def _attn_core(q_all, kv_all, wo_ref, bias_o, *, bt, q_len, kv_len, heads, head_dim,
               compute_dtype, approx_recip):
    """Multi-head attention given projected Q (M,E) and fused KV (Mk,2E).

    Per-head softmax(Q_h K_h^T / sqrt(D)) V_h is computed with single-batch-dim
    3-D einsums (known-good Mosaic pattern); the head outputs are lane-concatenated
    once and the output projection runs as ONE full-K (M,E)@(E,E) MXU matmul.
    """
    e = heads * head_dim
    cd = compute_dtype
    m = bt * q_len

    # Scale + cast once (not per head).
    q_c = (q_all * (1.0 / math.sqrt(head_dim))).astype(cd)   # (M,  E)
    k_c = kv_all[:, :e].astype(cd)                           # (Mk, E)
    v_c = kv_all[:, e:].astype(cd)                           # (Mk, E)

    head_outs = []
    for h in range(heads):
        lo = h * head_dim
        hi = lo + head_dim
        qh = q_c[:, lo:hi].reshape(bt, q_len, head_dim)
        kh = k_c[:, lo:hi].reshape(bt, kv_len, head_dim)
        vh = v_c[:, lo:hi].reshape(bt, kv_len, head_dim)

        # Batched (over the batch block) scaled-dot-product scores.
        s = jnp.einsum('bqd,bkd->bqk', qh, kh, preferred_element_type=jnp.float32)
        s = s - jnp.max(s, axis=-1, keepdims=True)
        p = jnp.exp(s)
        denom = jnp.sum(p, axis=-1, keepdims=True)
        if approx_recip:
            p = p * pl.reciprocal(denom, approx=True)    # EUP slot, nearly free
        else:
            p = p / denom

        o_h = jnp.einsum('bqk,bkd->bqd', p.astype(cd), vh,
                         preferred_element_type=jnp.float32)
        head_outs.append(o_h.reshape(m, head_dim))

    # Reassemble heads along lanes (cheap) -> one full-K output projection matmul.
    o_all = jnp.concatenate(head_outs, axis=-1)          # (M, E) f32
    out = jnp.dot(o_all.astype(cd), wo_ref[...],
                  preferred_element_type=jnp.float32)    # (M, E) f32
    return out + bias_o


# ---------------------------------------------------------------------------
# Kernel body (one batch-block per grid step)
# ---------------------------------------------------------------------------

def _decoder_layer_kernel(
        dec_ref, enc_ref,
        # self-attention params
        wqkv1_ref, wo1_ref, bo1_ref, g1_ref, be1_ref,
        # cross-attention params
        wq2_ref, wkv2_ref, wo2_ref, bo2_ref, g2_ref, be2_ref,
        # FFN + final norm params
        w1_ref, b1_ref, w2_ref, b2_ref, g3_ref, be3_ref,
        out_ref,
        *, heads, head_dim, q_len, kv_len, eps, compute_dtype, approx_recip,
        ffn_block):
    e = heads * head_dim
    bt = dec_ref.shape[0]
    m = bt * q_len
    cd = compute_dtype

    dec2d = dec_ref[...].reshape(m, e)                 # (M, E)  f32
    enc2d = enc_ref[...].reshape(bt * kv_len, e)       # (Mk, E) f32

    # ---- 1) masked self-attention (mask=None path) + residual + LayerNorm ----
    qkv = jnp.dot(dec2d.astype(cd), wqkv1_ref[...],
                  preferred_element_type=jnp.float32)  # (M, 3E), fused QKV proj
    sa = _attn_core(qkv[:, :e], qkv[:, e:], wo1_ref, bo1_ref[...],
                    bt=bt, q_len=q_len, kv_len=q_len, heads=heads,
                    head_dim=head_dim, compute_dtype=cd, approx_recip=approx_recip)
    x = _layer_norm(dec2d + sa, g1_ref[...], be1_ref[...], eps, approx_recip)

    # ---- 2) cross-attention (q from x, k/v from encoder) + residual + LayerNorm ----
    q2 = jnp.dot(x.astype(cd), wq2_ref[...],
                 preferred_element_type=jnp.float32)                    # (M, E)
    kv2 = jnp.dot(enc2d.astype(cd), wkv2_ref[...],
                  preferred_element_type=jnp.float32)                   # (Mk, 2E)
    ca = _attn_core(q2, kv2, wo2_ref, bo2_ref[...],
                    bt=bt, q_len=q_len, kv_len=kv_len, heads=heads,
                    head_dim=head_dim, compute_dtype=cd, approx_recip=approx_recip)
    x = _layer_norm(x + ca, g2_ref[...], be2_ref[...], eps, approx_recip)

    # ---- 3) position-wise FFN (hidden dim processed in chunks) + residual + LN ----
    x_c = x.astype(cd)
    w1 = w1_ref[...]
    w2 = w2_ref[...]
    b1 = b1_ref[...]
    ffn_hidden = w1.shape[1]
    f = None
    for lo in range(0, ffn_hidden, ffn_block):
        hi = min(lo + ffn_block, ffn_hidden)
        hc = jnp.dot(x_c, w1[:, lo:hi], preferred_element_type=jnp.float32)
        hc = jnp.maximum(hc + b1[:, lo:hi], 0.0)
        contrib = jnp.dot(hc.astype(cd), w2[lo:hi, :],
                          preferred_element_type=jnp.float32)
        f = contrib if f is None else f + contrib
    x = _layer_norm(x + f + b2_ref[...], g3_ref[...], be3_ref[...], eps, approx_recip)

    out_ref[...] = x.reshape(bt, q_len, e).astype(out_ref.dtype)


# ---------------------------------------------------------------------------
# Wrapper
# ---------------------------------------------------------------------------

def _pick_block_batch(n, q_len, target_rows=512, min_grid=2):
    """Largest divisor of n with bt*q_len <= target_rows (fills the MXU M dim),
    additionally capped so the grid keeps >= min_grid steps (v7x megacore)."""
    target = max(1, target_rows // max(q_len, 1))
    if n >= min_grid:
        target = min(target, max(1, n // min_grid))
    bt = 1
    for d in range(1, n + 1):
        if n % d == 0 and d <= target:
            bt = d
    return bt


def _vmem_limit_bytes(bt, q_len, kv_len, e, ffn_hidden, ffn_block, compute_dtype):
    """Rough scoped-VMEM budget: double-buffered resident weights + activation slabs."""
    wbytes = jnp.dtype(compute_dtype).itemsize
    weights = wbytes * (3 * e * e      # fused QKV (self)
                        + e * e        # Wo (self)
                        + e * e        # Wq (cross)
                        + 2 * e * e    # fused KV (cross)
                        + e * e        # Wo (cross)
                        + e * ffn_hidden + ffn_hidden * e)
    vectors = 4 * (9 * e + ffn_hidden)
    m, mk = bt * q_len, bt * kv_len
    io_blocks = 4 * 2 * (m * e + mk * e + m * e)          # dec/enc/out, double-buffered
    working = 4 * (3 * m * e + 2 * mk * e + m * ffn_block + 6 * m * e)
    est = 2 * weights + vectors + io_blocks + working + (8 << 20)
    try:
        cap = int(pltpu.get_tpu_info().vmem_capacity_bytes)
    except Exception:
        cap = 64 << 20                                     # v7x physical floor
    return int(min(max(est, 32 << 20), cap))


def decoder_layer_forward(enc, dec, params, *, heads, eps=1e-10,
                          p_mask=None, mask=None,
                          compute_dtype=jnp.bfloat16, block_batch=None,
                          ffn_block=None, approx_recip=True):
    """enc: (N, enc_len, E), dec: (N, dec_len, E).  Returns (N, dec_len, E)."""
    if mask is not None or p_mask is not None:
        # TODO(synk): attention masks are not implemented (mask=None path only).
        raise NotImplementedError("mask / p_mask are not supported by this kernel")

    n, q_len, e = dec.shape
    kv_len = enc.shape[1]
    head_dim = e // heads
    ffn_hidden = params['w1'].shape[0]
    if ffn_block is None:
        ffn_block = ffn_hidden if ffn_hidden <= 1024 else 1024

    wt = lambda w: w.T.astype(compute_dtype)            # pre-transpose (+ pre-cast) once
    row = lambda v: v.reshape(1, -1)

    # Fused / pre-transposed weights (paid once in HBM, never inside the kernel).
    wqkv1 = jnp.concatenate(
        [params['wq1'].T, params['wk1'].T, params['wv1'].T], axis=1).astype(compute_dtype)
    wo1_t = wt(params['wo1'])
    wq2_t = wt(params['wq2'])
    wkv2 = jnp.concatenate(
        [params['wk2'].T, params['wv2'].T], axis=1).astype(compute_dtype)
    wo2_t = wt(params['wo2'])
    w1_t = wt(params['w1'])          # (E, ffn_hidden)
    w2_t = wt(params['w2'])          # (ffn_hidden, E)

    bt = block_batch if block_batch is not None else _pick_block_batch(n, q_len)
    assert n % bt == 0, "block_batch must divide the batch size"
    grid = (n // bt,)

    batch_map = lambda b: (b, 0, 0)
    const2d = lambda b: (0, 0)
    full = lambda shape: pl.BlockSpec(shape, const2d)

    in_specs = [
        pl.BlockSpec((bt, q_len, e), batch_map),          # dec
        pl.BlockSpec((bt, kv_len, e), batch_map),         # enc
        full((e, 3 * e)), full((e, e)), full((1, e)), full((1, e)), full((1, e)),
        full((e, e)), full((e, 2 * e)), full((e, e)), full((1, e)), full((1, e)), full((1, e)),
        full((e, ffn_hidden)), full((1, ffn_hidden)), full((ffn_hidden, e)), full((1, e)),
        full((1, e)), full((1, e)),
    ]

    kernel = functools.partial(
        _decoder_layer_kernel,
        heads=heads, head_dim=head_dim, q_len=q_len, kv_len=kv_len, eps=eps,
        compute_dtype=compute_dtype, approx_recip=approx_recip, ffn_block=ffn_block)

    vmem_limit = _vmem_limit_bytes(bt, q_len, kv_len, e, ffn_hidden, ffn_block,
                                   compute_dtype)

    return pl.pallas_call(
        kernel,
        out_shape=jax.ShapeDtypeStruct((n, q_len, e), dec.dtype),
        grid_spec=pltpu.PrefetchScalarGridSpec(
            num_scalar_prefetch=0,
            grid=grid,
            in_specs=in_specs,
            out_specs=pl.BlockSpec((bt, q_len, e), batch_map),
        ),
        compiler_params=pltpu.CompilerParams(
            dimension_semantics=("parallel",),
            vmem_limit_bytes=vmem_limit),
    )(dec, enc,
      wqkv1, wo1_t, row(params['bo1']), row(params['g1']), row(params['be1']),
      wq2_t, wkv2, wo2_t, row(params['bo2']), row(params['g2']), row(params['be2']),
      w1_t, row(params['b1']), w2_t, row(params['b2']),
      row(params['g3']), row(params['be3']))


# ---------------------------------------------------------------------------
# Plain-JAX reference (mirrors the PyTorch module, dropout in eval mode)
# ---------------------------------------------------------------------------

def _mhsa_reference(q, k, v, wq, wk, wv, wo, bo, heads):
    n, q_len, e = q.shape
    k_len, v_len = k.shape[1], v.shape[1]
    d = e // heads
    Q = (q @ wq.T).reshape(n, q_len, heads, d).transpose(0, 2, 1, 3)
    K = (k @ wk.T).reshape(n, k_len, heads, d).transpose(0, 2, 1, 3)
    V = (v @ wv.T).reshape(n, v_len, heads, d).transpose(0, 2, 1, 3)
    s = (Q @ K.transpose(0, 1, 3, 2)) / math.sqrt(d)
    p = jax.nn.softmax(s, axis=-1)
    out = (p @ V).transpose(0, 2, 1, 3).reshape(n, q_len, e)
    return out @ wo.T + bo


def decoder_layer_reference(enc, dec, params, *, heads, eps=1e-10):
    p = params

    def ln(x, g, b):
        mean = x.mean(axis=-1, keepdims=True)
        std = jnp.std(x, axis=-1, keepdims=True, ddof=1)   # torch std: unbiased
        return g * (x - mean) / (std + eps) + b

    x = ln(dec + _mhsa_reference(dec, dec, dec, p['wq1'], p['wk1'], p['wv1'],
                                 p['wo1'], p['bo1'], heads), p['g1'], p['be1'])
    x = ln(x + _mhsa_reference(x, enc, enc, p['wq2'], p['wk2'], p['wv2'],
                               p['wo2'], p['bo2'], heads), p['g2'], p['be2'])
    f = jnp.maximum(x @ p['w1'].T + p['b1'], 0.0) @ p['w2'].T + p['b2']
    x = ln(x + f, p['g3'], p['be3'])
    return x


# ---------------------------------------------------------------------------
# Demo / self-test
# ---------------------------------------------------------------------------

if __name__ == "__main__":
    N, DEC_LEN, ENC_LEN = 2, 8, 16
    E, HEADS, FFN_HIDDEN = 128, 4, 256   # E=128 keeps every tile/store lane-dense
    # drop_prob of the module is irrelevant here: dropout runs in eval (identity) mode.

    key = jax.random.PRNGKey(0)
    ks = iter(jax.random.split(key, 32))
    uni = lambda k, shape, b: jax.random.uniform(k, shape, jnp.float32, -b, b)

    be_ = 1.0 / math.sqrt(E)
    bh_ = 1.0 / math.sqrt(FFN_HIDDEN)
    params = {
        # self-attention
        'wq1': uni(next(ks), (E, E), be_), 'wk1': uni(next(ks), (E, E), be_),
        'wv1': uni(next(ks), (E, E), be_), 'wo1': uni(next(ks), (E, E), be_),
        'bo1': uni(next(ks), (E,), be_),
        # cross-attention
        'wq2': uni(next(ks), (E, E), be_), 'wk2': uni(next(ks), (E, E), be_),
        'wv2': uni(next(ks), (E, E), be_), 'wo2': uni(next(ks), (E, E), be_),
        'bo2': uni(next(ks), (E,), be_),
        # FFN
        'w1': uni(next(ks), (FFN_HIDDEN, E), be_), 'b1': uni(next(ks), (FFN_HIDDEN,), be_),
        'w2': uni(next(ks), (E, FFN_HIDDEN), bh_), 'b2': uni(next(ks), (E,), bh_),
        # LayerNorms (randomized so the check exercises gamma/beta)
        'g1': 1.0 + 0.1 * jax.random.normal(next(ks), (E,), jnp.float32),
        'be1': 0.1 * jax.random.normal(next(ks), (E,), jnp.float32),
        'g2': 1.0 + 0.1 * jax.random.normal(next(ks), (E,), jnp.float32),
        'be2': 0.1 * jax.random.normal(next(ks), (E,), jnp.float32),
        'g3': 1.0 + 0.1 * jax.random.normal(next(ks), (E,), jnp.float32),
        'be3': 0.1 * jax.random.normal(next(ks), (E,), jnp.float32),
    }

    enc = jax.random.normal(next(ks), (N, ENC_LEN, E), jnp.float32)
    dec = jax.random.normal(next(ks), (N, DEC_LEN, E), jnp.float32)

    # High-precision reference.
    with jax.default_matmul_precision('highest'):
        ref = decoder_layer_reference(enc, dec, params, heads=HEADS)
        ref = jax.block_until_ready(ref)

    # Default path: bf16-input / f32-accumulate MXU (recommended on v5e/v6e/v7x).
    out = decoder_layer_forward(enc, dec, params, heads=HEADS)
    out = jax.block_until_ready(out)
    assert out.shape == (N, DEC_LEN, E)
    assert jnp.allclose(out, ref, atol=6e-2, rtol=6e-2), "bf16 path mismatch vs reference"

    # f32-activation path (tolerance allows for MXU default-precision matmuls,
    # approx EUP reciprocals and the fused / per-head-decomposed summation order).
    out_f32 = decoder_layer_forward(enc, dec, params, heads=HEADS,
                                    compute_dtype=jnp.float32)
    out_f32 = jax.block_until_ready(out_f32)
    assert jnp.allclose(out_f32, ref, atol=3e-2, rtol=3e-2), "f32 path mismatch vs reference"

    print("KERNEL_OK")
</pallas_src>

<mosaic_0001>
module attributes {stable_mosaic.version = 11 : i64} {
  func.func @_decoder_layer_kernel(%arg0: i32, %arg1: memref<1x8x128xf32, #tpu.memory_space<vmem>>, %arg2: memref<1x16x128xf32, #tpu.memory_space<vmem>>, %arg3: memref<128x384xbf16, #tpu.memory_space<vmem>>, %arg4: memref<128x128xbf16, #tpu.memory_space<vmem>>, %arg5: memref<1x128xf32, #tpu.memory_space<vmem>>, %arg6: memref<1x128xf32, #tpu.memory_space<vmem>>, %arg7: memref<1x128xf32, #tpu.memory_space<vmem>>, %arg8: memref<128x128xbf16, #tpu.memory_space<vmem>>, %arg9: memref<128x256xbf16, #tpu.memory_space<vmem>>, %arg10: memref<128x128xbf16, #tpu.memory_space<vmem>>, %arg11: memref<1x128xf32, #tpu.memory_space<vmem>>, %arg12: memref<1x128xf32, #tpu.memory_space<vmem>>, %arg13: memref<1x128xf32, #tpu.memory_space<vmem>>, %arg14: memref<128x256xbf16, #tpu.memory_space<vmem>>, %arg15: memref<1x256xf32, #tpu.memory_space<vmem>>, %arg16: memref<256x128xbf16, #tpu.memory_space<vmem>>, %arg17: memref<1x128xf32, #tpu.memory_space<vmem>>, %arg18: memref<1x128xf32, #tpu.memory_space<vmem>>, %arg19: memref<1x128xf32, #tpu.memory_space<vmem>>, %arg20: memref<1x8x128xf32, #tpu.memory_space<vmem>>) attributes {dimension_semantics = [#tpu.dimension_semantics<parallel>], iteration_bounds = array<i64: 2>, scalar_prefetch = 0 : i64, scratch_operands = 0 : i64, tpu.core_type = #tpu.core_type<tc>, window_params = [{transform_indices = @transform_0, window_bounds = array<i64: 1, 8, 128>}, {transform_indices = @transform_1, window_bounds = array<i64: 1, 16, 128>}, {pipeline_mode = #tpu.pipeline_mode<synchronous>, transform_indices = @transform_2, window_bounds = array<i64: 128, 384>}, {pipeline_mode = #tpu.pipeline_mode<synchronous>, transform_indices = @transform_3, window_bounds = array<i64: 128, 128>}, {pipeline_mode = #tpu.pipeline_mode<synchronous>, transform_indices = @transform_4, window_bounds = array<i64: 1, 128>}, {pipeline_mode = #tpu.pipeline_mode<synchronous>, transform_indices = @transform_5, window_bounds = array<i64: 1, 128>}, {pipeline_mode = #tpu.pipeline_mode<synchronous>, transform_indices = @transform_6, window_bounds = array<i64: 1, 128>}, {pipeline_mode = #tpu.pipeline_mode<synchronous>, transform_indices = @transform_7, window_bounds = array<i64: 128, 128>}, {pipeline_mode = #tpu.pipeline_mode<synchronous>, transform_indices = @transform_8, window_bounds = array<i64: 128, 256>}, {pipeline_mode = #tpu.pipeline_mode<synchronous>, transform_indices = @transform_9, window_bounds = array<i64: 128, 128>}, {pipeline_mode = #tpu.pipeline_mode<synchronous>, transform_indices = @transform_10, window_bounds = array<i64: 1, 128>}, {pipeline_mode = #tpu.pipeline_mode<synchronous>, transform_indices = @transform_11, window_bounds = array<i64: 1, 128>}, {pipeline_mode = #tpu.pipeline_mode<synchronous>, transform_indices = @transform_12, window_bounds = array<i64: 1, 128>}, {pipeline_mode = #tpu.pipeline_mode<synchronous>, transform_indices = @transform_13, window_bounds = array<i64: 128, 256>}, {pipeline_mode = #tpu.pipeline_mode<synchronous>, transform_indices = @transform_14, window_bounds = array<i64: 1, 256>}, {pipeline_mode = #tpu.pipeline_mode<synchronous>, transform_indices = @transform_15, window_bounds = array<i64: 256, 128>}, {pipeline_mode = #tpu.pipeline_mode<synchronous>, transform_indices = @transform_16, window_bounds = array<i64: 1, 128>}, {pipeline_mode = #tpu.pipeline_mode<synchronous>, transform_indices = @transform_17, window_bounds = array<i64: 1, 128>}, {pipeline_mode = #tpu.pipeline_mode<synchronous>, transform_indices = @transform_18, window_bounds = array<i64: 1, 128>}, {transform_indices = @transform_19, window_bounds = array<i64: 1, 8, 128>}]} {
    %c0 = arith.constant 0 : index
    %c0_0 = arith.constant 0 : index
    %c0_1 = arith.constant 0 : index
    %0 = vector.load %arg1[%c0, %c0_0, %c0_1] : memref<1x8x128xf32, #tpu.memory_space<vmem>>, vector<1x8x128xf32>
    %1 = vector.shape_cast %0 : vector<1x8x128xf32> to vector<8x128xf32>
    %c0_2 = arith.constant 0 : index
    %c0_3 = arith.constant 0 : index
    %c0_4 = arith.constant 0 : index
    %2 = vector.load %arg2[%c0_2, %c0_3, %c0_4] : memref<1x16x128xf32, #tpu.memory_space<vmem>>, vector<1x16x128xf32>
    %3 = vector.shape_cast %2 : vector<1x16x128xf32> to vector<16x128xf32>
    %4 = arith.truncf %1 : vector<8x128xf32> to vector<8x128xbf16>
    %c0_5 = arith.constant 0 : index
    %c0_6 = arith.constant 0 : index
    %5 = vector.load %arg3[%c0_5, %c0_6] : memref<128x384xbf16, #tpu.memory_space<vmem>>, vector<128x384xbf16>
    %cst = arith.constant dense<0.000000e+00> : vector<8x384xf32>
    %6 = tpu.matmul %4, %5, %cst {dimension_numbers = #tpu.dot_dimension_numbers<[1], [0], [0], [1], [0, 0, 1, 1], [], []>} : vector<8x128xbf16>, vector<128x384xbf16>, vector<8x384xf32> -> vector<8x384xf32>
    %7 = vector.extract_strided_slice %6 {offsets = [0, 0], sizes = [8, 128], strides = [1, 1]} : vector<8x384xf32> to vector<8x128xf32>
    %8 = vector.extract_strided_slice %6 {offsets = [0, 128], sizes = [8, 256], strides = [1, 1]} : vector<8x384xf32> to vector<8x256xf32>
    %c0_7 = arith.constant 0 : index
    %c0_8 = arith.constant 0 : index
    %9 = vector.load %arg5[%c0_7, %c0_8] : memref<1x128xf32, #tpu.memory_space<vmem>>, vector<1x128xf32>
    %cst_9 = arith.constant 0.176776692 : f32
    %10 = vector.broadcast %cst_9 : f32 to vector<8x128xf32>
    %11 = arith.mulf %7, %10 : vector<8x128xf32>
    %12 = arith.truncf %11 : vector<8x128xf32> to vector<8x128xbf16>
    %13 = vector.extract_strided_slice %8 {offsets = [0, 0], sizes = [8, 128], strides = [1, 1]} : vector<8x256xf32> to vector<8x128xf32>
    %14 = arith.truncf %13 : vector<8x128xf32> to vector<8x128xbf16>
    %15 = vector.extract_strided_slice %8 {offsets = [0, 128], sizes = [8, 128], strides = [1, 1]} : vector<8x256xf32> to vector<8x128xf32>
    %16 = arith.truncf %15 : vector<8x128xf32> to vector<8x128xbf16>
    %17 = vector.extract_strided_slice %12 {offsets = [0, 0], sizes = [8, 32], strides = [1, 1]} : vector<8x128xbf16> to vector<8x32xbf16>
    %18 = vector.shape_cast %17 : vector<8x32xbf16> to vector<1x8x32xbf16>
    %19 = vector.extract_strided_slice %14 {offsets = [0, 0], sizes = [8, 32], strides = [1, 1]} : vector<8x128xbf16> to vector<8x32xbf16>
    %20 = vector.shape_cast %19 : vector<8x32xbf16> to vector<1x8x32xbf16>
    %21 = vector.extract_strided_slice %16 {offsets = [0, 0], sizes = [8, 32], strides = [1, 1]} : vector<8x128xbf16> to vector<8x32xbf16>
    %22 = vector.shape_cast %21 : vector<8x32xbf16> to vector<1x8x32xbf16>
    "tpu.trace_start"() <{level = 10 : i32, message = "bqd,bkd->bqk"}> : () -> ()
    %cst_10 = arith.constant dense<0.000000e+00> : vector<1x8x8xf32>
    %23 = tpu.matmul %18, %20, %cst_10 {dimension_numbers = #tpu.dot_dimension_numbers<[2], [2], [1], [1], [0, 0, 0, 1, 1, 1], [0], [0]>} : vector<1x8x32xbf16>, vector<1x8x32xbf16>, vector<1x8x8xf32> -> vector<1x8x8xf32>
    "tpu.trace_stop"() : () -> ()
    %cst_11 = arith.constant dense<0xFF800000> : vector<1x8xf32>
    %24 = vector.multi_reduction <maximumf>, %23, %cst_11 [2] : vector<1x8x8xf32> to vector<1x8xf32>
    %25 = vector.shape_cast %24 : vector<1x8xf32> to vector<1x8x1xf32>
    %26 = vector.broadcast %25 : vector<1x8x1xf32> to vector<1x8x8xf32>
    %27 = arith.subf %23, %26 : vector<1x8x8xf32>
    %28 = math.exp %27 : vector<1x8x8xf32>
    %cst_12 = arith.constant dense<0.000000e+00> : vector<1x8xf32>
    %29 = vector.multi_reduction <add>, %28, %cst_12 [2] : vector<1x8x8xf32> to vector<1x8xf32>
    %30 = vector.shape_cast %29 : vector<1x8xf32> to vector<1x8x1xf32>
    %31 = tpu.reciprocal %30 {approx = true} : vector<1x8x1xf32> -> vector<1x8x1xf32>
    %32 = vector.broadcast %31 : vector<1x8x1xf32> to vector<1x8x8xf32>
    %33 = arith.mulf %28, %32 : vector<1x8x8xf32>
    %34 = arith.truncf %33 : vector<1x8x8xf32> to vector<1x8x8xbf16>
    "tpu.trace_start"() <{level = 10 : i32, message = "bqk,bkd->bqd"}> : () -> ()
    %cst_13 = arith.constant dense<0.000000e+00> : vector<1x8x32xf32>
    %35 = tpu.matmul %34, %22, %cst_13 {dimension_numbers = #tpu.dot_dimension_numbers<[2], [1], [1], [2], [0, 0, 0, 1, 1, 2], [0], [0]>} : vector<1x8x8xbf16>, vector<1x8x32xbf16>, vector<1x8x32xf32> -> vector<1x8x32xf32>
    "tpu.trace_stop"() : () -> ()
    %36 = vector.shape_cast %35 : vector<1x8x32xf32> to vector<8x32xf32>
    %37 = vector.extract_strided_slice %12 {offsets = [0, 32], sizes = [8, 32], strides = [1, 1]} : vector<8x128xbf16> to vector<8x32xbf16>
    %38 = vector.shape_cast %37 : vector<8x32xbf16> to vector<1x8x32xbf16>
    %39 = vector.extract_strided_slice %14 {offsets = [0, 32], sizes = [8, 32], strides = [1, 1]} : vector<8x128xbf16> to vector<8x32xbf16>
    %40 = vector.shape_cast %39 : vector<8x32xbf16> to vector<1x8x32xbf16>
    %41 = vector.extract_strided_slice %16 {offsets = [0, 32], sizes = [8, 32], strides = [1, 1]} : vector<8x128xbf16> to vector<8x32xbf16>
    %42 = vector.shape_cast %41 : vector<8x32xbf16> to vector<1x8x32xbf16>
    "tpu.trace_start"() <{level = 10 : i32, message = "bqd,bkd->bqk"}> : () -> ()
    %cst_14 = arith.constant dense<0.000000e+00> : vector<1x8x8xf32>
    %43 = tpu.matmul %38, %40, %cst_14 {dimension_numbers = #tpu.dot_dimension_numbers<[2], [2], [1], [1], [0, 0, 0, 1, 1, 1], [0], [0]>} : vector<1x8x32xbf16>, vector<1x8x32xbf16>, vector<1x8x8xf32> -> vector<1x8x8xf32>
    "tpu.trace_stop"() : () -> ()
    %cst_15 = arith.constant dense<0xFF800000> : vector<1x8xf32>
    %44 = vector.multi_reduction <maximumf>, %43, %cst_15 [2] : vector<1x8x8xf32> to vector<1x8xf32>
    %45 = vector.shape_cast %44 : vector<1x8xf32> to vector<1x8x1xf32>
    %46 = vector.broadcast %45 : vector<1x8x1xf32> to vector<1x8x8xf32>
    %47 = arith.subf %43, %46 : vector<1x8x8xf32>
    %48 = math.exp %47 : vector<1x8x8xf32>
    %cst_16 = arith.constant dense<0.000000e+00> : vector<1x8xf32>
    %49 = vector.multi_reduction <add>, %48, %cst_16 [2] : vector<1x8x8xf32> to vector<1x8xf32>
    %50 = vector.shape_cast %49 : vector<1x8xf32> to vector<1x8x1xf32>
    %51 = tpu.reciprocal %50 {approx = true} : vector<1x8x1xf32> -> vector<1x8x1xf32>
    %52 = vector.broadcast %51 : vector<1x8x1xf32> to vector<1x8x8xf32>
    %53 = arith.mulf %48, %52 : vector<1x8x8xf32>
    %54 = arith.truncf %53 : vector<1x8x8xf32> to vector<1x8x8xbf16>
    "tpu.trace_start"() <{level = 10 : i32, message = "bqk,bkd->bqd"}> : () -> ()
    %cst_17 = arith.constant dense<0.000000e+00> : vector<1x8x32xf32>
    %55 = tpu.matmul %54, %42, %cst_17 {dimension_numbers = #tpu.dot_dimension_numbers<[2], [1], [1], [2], [0, 0, 0, 1, 1, 2], [0], [0]>} : vector<1x8x8xbf16>, vector<1x8x32xbf16>, vector<1x8x32xf32> -> vector<1x8x32xf32>
    "tpu.trace_stop"() : () -> ()
    %56 = vector.shape_cast %55 : vector<1x8x32xf32> to vector<8x32xf32>
    %57 = vector.extract_strided_slice %12 {offsets = [0, 64], sizes = [8, 32], strides = [1, 1]} : vector<8x128xbf16> to vector<8x32xbf16>
    %58 = vector.shape_cast %57 : vector<8x32xbf16> to vector<1x8x32xbf16>
    %59 = vector.extract_strided_slice %14 {offsets = [0, 64], sizes = [8, 32], strides = [1, 1]} : vector<8x128xbf16> to vector<8x32xbf16>
    %60 = vector.shape_cast %59 : vector<8x32xbf16> to vector<1x8x32xbf16>
    %61 = vector.extract_strided_slice %16 {offsets = [0, 64], sizes = [8, 32], strides = [1, 1]} : vector<8x128xbf16> to vector<8x32xbf16>
    %62 = vector.shape_cast %61 : vector<8x32xbf16> to vector<1x8x32xbf16>
    "tpu.trace_start"() <{level = 10 : i32, message = "bqd,bkd->bqk"}> : () -> ()
    %cst_18 = arith.constant dense<0.000000e+00> : vector<1x8x8xf32>
    %63 = tpu.matmul %58, %60, %cst_18 {dimension_numbers = #tpu.dot_dimension_numbers<[2], [2], [1], [1], [0, 0, 0, 1, 1, 1], [0], [0]>} : vector<1x8x32xbf16>, vector<1x8x32xbf16>, vector<1x8x8xf32> -> vector<1x8x8xf32>
    "tpu.trace_stop"() : () -> ()
    %cst_19 = arith.constant dense<0xFF800000> : vector<1x8xf32>
    %64 = vector.multi_reduction <maximumf>, %63, %cst_19 [2] : vector<1x8x8xf32> to vector<1x8xf32>
    %65 = vector.shape_cast %64 : vector<1x8xf32> to vector<1x8x1xf32>
    %66 = vector.broadcast %65 : vector<1x8x1xf32> to vector<1x8x8xf32>
    %67 = arith.subf %63, %66 : vector<1x8x8xf32>
    %68 = math.exp %67 : vector<1x8x8xf32>
    %cst_20 = arith.constant dense<0.000000e+00> : vector<1x8xf32>
    %69 = vector.multi_reduction <add>, %68, %cst_20 [2] : vector<1x8x8xf32> to vector<1x8xf32>
    %70 = vector.shape_cast %69 : vector<1x8xf32> to vector<1x8x1xf32>
    %71 = tpu.reciprocal %70 {approx = true} : vector<1x8x1xf32> -> vector<1x8x1xf32>
    %72 = vector.broadcast %71 : vector<1x8x1xf32> to vector<1x8x8xf32>
    %73 = arith.mulf %68, %72 : vector<1x8x8xf32>
    %74 = arith.truncf %73 : vector<1x8x8xf32> to vector<1x8x8xbf16>
    "tpu.trace_start"() <{level = 10 : i32, message = "bqk,bkd->bqd"}> : () -> ()
    %cst_21 = arith.constant dense<0.000000e+00> : vector<1x8x32xf32>
    %75 = tpu.matmul %74, %62, %cst_21 {dimension_numbers = #tpu.dot_dimension_numbers<[2], [1], [1], [2], [0, 0, 0, 1, 1, 2], [0], [0]>} : vector<1x8x8xbf16>, vector<1x8x32xbf16>, vector<1x8x32xf32> -> vector<1x8x32xf32>
    "tpu.trace_stop"() : () -> ()
    %76 = vector.shape_cast %75 : vector<1x8x32xf32> to vector<8x32xf32>
    %77 = vector.extract_strided_slice %12 {offsets = [0, 96], sizes = [8, 32], strides = [1, 1]} : vector<8x128xbf16> to vector<8x32xbf16>
    %78 = vector.shape_cast %77 : vector<8x32xbf16> to vector<1x8x32xbf16>
    %79 = vector.extract_strided_slice %14 {offsets = [0, 96], sizes = [8, 32], strides = [1, 1]} : vector<8x128xbf16> to vector<8x32xbf16>
    %80 = vector.shape_cast %79 : vector<8x32xbf16> to vector<1x8x32xbf16>
    %81 = vector.extract_strided_slice %16 {offsets = [0, 96], sizes = [8, 32], strides = [1, 1]} : vector<8x128xbf16> to vector<8x32xbf16>
    %82 = vector.shape_cast %81 : vector<8x32xbf16> to vector<1x8x32xbf16>
    "tpu.trace_start"() <{level = 10 : i32, message = "bqd,bkd->bqk"}> : () -> ()
    %cst_22 = arith.constant dense<0.000000e+00> : vector<1x8x8xf32>
    %83 = tpu.matmul %78, %80, %cst_22 {dimension_numbers = #tpu.dot_dimension_numbers<[2], [2], [1], [1], [0, 0, 0, 1, 1, 1], [0], [0]>} : vector<1x8x32xbf16>, vector<1x8x32xbf16>, vector<1x8x8xf32> -> vector<1x8x8xf32>
    "tpu.trace_stop"() : () -> ()
    %cst_23 = arith.constant dense<0xFF800000> : vector<1x8xf32>
    %84 = vector.multi_reduction <maximumf>, %83, %cst_23 [2] : vector<1x8x8xf32> to vector<1x8xf32>
    %85 = vector.shape_cast %84 : vector<1x8xf32> to vector<1x8x1xf32>
    %86 = vector.broadcast %85 : vector<1x8x1xf32> to vector<1x8x8xf32>
    %87 = arith.subf %83, %86 : vector<1x8x8xf32>
    %88 = math.exp %87 : vector<1x8x8xf32>
    %cst_24 = arith.constant dense<0.000000e+00> : vector<1x8xf32>
    %89 = vector.multi_reduction <add>, %88, %cst_24 [2] : vector<1x8x8xf32> to vector<1x8xf32>
    %90 = vector.shape_cast %89 : vector<1x8xf32> to vector<1x8x1xf32>
    %91 = tpu.reciprocal %90 {approx = true} : vector<1x8x1xf32> -> vector<1x8x1xf32>
    %92 = vector.broadcast %91 : vector<1x8x1xf32> to vector<1x8x8xf32>
    %93 = arith.mulf %88, %92 : vector<1x8x8xf32>
    %94 = arith.truncf %93 : vector<1x8x8xf32> to vector<1x8x8xbf16>
    "tpu.trace_start"() <{level = 10 : i32, message = "bqk,bkd->bqd"}> : () -> ()
    %cst_25 = arith.constant dense<0.000000e+00> : vector<1x8x32xf32>
    %95 = tpu.matmul %94, %82, %cst_25 {dimension_numbers = #tpu.dot_dimension_numbers<[2], [1], [1], [2], [0, 0, 0, 1, 1, 2], [0], [0]>} : vector<1x8x8xbf16>, vector<1x8x32xbf16>, vector<1x8x32xf32> -> vector<1x8x32xf32>
    "tpu.trace_stop"() : () -> ()
    %96 = vector.shape_cast %95 : vector<1x8x32xf32> to vector<8x32xf32>
    %97 = tpu.concatenate %36, %56, %76, %96 in 1 : vector<8x32xf32>, vector<8x32xf32>, vector<8x32xf32>, vector<8x32xf32> -> vector<8x128xf32>
    %98 = arith.truncf %97 : vector<8x128xf32> to vector<8x128xbf16>
    %c0_26 = arith.constant 0 : index
    %c0_27 = arith.constant 0 : index
    %99 = vector.load %arg4[%c0_26, %c0_27] : memref<128x128xbf16, #tpu.memory_space<vmem>>, vector<128x128xbf16>
    %cst_28 = arith.constant dense<0.000000e+00> : vector<8x128xf32>
    %100 = tpu.matmul %98, %99, %cst_28 {dimension_numbers = #tpu.dot_dimension_numbers<[1], [0], [0], [1], [0, 0, 1, 1], [], []>} : vector<8x128xbf16>, vector<128x128xbf16>, vector<8x128xf32> -> vector<8x128xf32>
    %101 = vector.broadcast %9 : vector<1x128xf32> to vector<8x128xf32>
    %102 = arith.addf %100, %101 : vector<8x128xf32>
    %103 = arith.addf %1, %102 : vector<8x128xf32>
    %c0_29 = arith.constant 0 : index
    %c0_30 = arith.constant 0 : index
    %104 = vector.load %arg6[%c0_29, %c0_30] : memref<1x128xf32, #tpu.memory_space<vmem>>, vector<1x128xf32>
    %c0_31 = arith.constant 0 : index
    %c0_32 = arith.constant 0 : index
    %105 = vector.load %arg7[%c0_31, %c0_32] : memref<1x128xf32, #tpu.memory_space<vmem>>, vector<1x128xf32>
    %cst_33 = arith.constant dense<0.000000e+00> : vector<8xf32>
    %106 = vector.multi_reduction <add>, %103, %cst_33 [1] : vector<8x128xf32> to vector<8xf32>
    %107 = vector.shape_cast %106 : vector<8xf32> to vector<8x1xf32>
    %cst_34 = arith.constant 1.280000e+02 : f32
    %108 = vector.broadcast %cst_34 : f32 to vector<8x1xf32>
    %109 = arith.divf %107, %108 : vector<8x1xf32>
    %110 = vector.broadcast %109 : vector<8x1xf32> to vector<8x128xf32>
    %111 = arith.subf %103, %110 : vector<8x128xf32>
    %112 = arith.mulf %111, %111 : vector<8x128xf32>
    %cst_35 = arith.constant dense<0.000000e+00> : vector<8xf32>
    %113 = vector.multi_reduction <add>, %112, %cst_35 [1] : vector<8x128xf32> to vector<8xf32>
    %114 = vector.shape_cast %113 : vector<8xf32> to vector<8x1xf32>
    %cst_36 = arith.constant 0.00787401571 : f32
    %115 = vector.broadcast %cst_36 : f32 to vector<8x1xf32>
    %116 = arith.mulf %114, %115 : vector<8x1xf32>
    %117 = math.sqrt %116 : vector<8x1xf32>
    %cst_37 = arith.constant 1.000000e-10 : f32
    %118 = vector.broadcast %cst_37 : f32 to vector<8x1xf32>
    %119 = arith.addf %117, %118 : vector<8x1xf32>
    %120 = tpu.reciprocal %119 {approx = true} : vector<8x1xf32> -> vector<8x1xf32>
    %121 = vector.broadcast %120 : vector<8x1xf32> to vector<8x128xf32>
    %122 = arith.mulf %111, %121 : vector<8x128xf32>
    %123 = vector.broadcast %104 : vector<1x128xf32> to vector<8x128xf32>
    %124 = arith.mulf %122, %123 : vector<8x128xf32>
    %125 = vector.broadcast %105 : vector<1x128xf32> to vector<8x128xf32>
    %126 = arith.addf %124, %125 : vector<8x128xf32>
    %127 = arith.truncf %126 : vector<8x128xf32> to vector<8x128xbf16>
    %c0_38 = arith.constant 0 : index
    %c0_39 = arith.constant 0 : index
    %128 = vector.load %arg8[%c0_38, %c0_39] : memref<128x128xbf16, #tpu.memory_space<vmem>>, vector<128x128xbf16>
    %cst_40 = arith.constant dense<0.000000e+00> : vector<8x128xf32>
    %129 = tpu.matmul %127, %128, %cst_40 {dimension_numbers = #tpu.dot_dimension_numbers<[1], [0], [0], [1], [0, 0, 1, 1], [], []>} : vector<8x128xbf16>, vector<128x128xbf16>, vector<8x128xf32> -> vector<8x128xf32>
    %130 = arith.truncf %3 : vector<16x128xf32> to vector<16x128xbf16>
    %c0_41 = arith.constant 0 : index
    %c0_42 = arith.constant 0 : index
    %131 = vector.load %arg9[%c0_41, %c0_42] : memref<128x256xbf16, #tpu.memory_space<vmem>>, vector<128x256xbf16>
    %cst_43 = arith.constant dense<0.000000e+00> : vector<16x256xf32>
    %132 = tpu.matmul %130, %131, %cst_43 {dimension_numbers = #tpu.dot_dimension_numbers<[1], [0], [0], [1], [0, 0, 1, 1], [], []>} : vector<16x128xbf16>, vector<128x256xbf16>, vector<16x256xf32> -> vector<16x256xf32>
    %c0_44 = arith.constant 0 : index
    %c0_45 = arith.constant 0 : index
    %133 = vector.load %arg11[%c0_44, %c0_45] : memref<1x128xf32, #tpu.memory_space<vmem>>, vector<1x128xf32>
    %cst_46 = arith.constant 0.176776692 : f32
    %134 = vector.broadcast %cst_46 : f32 to vector<8x128xf32>
    %135 = arith.mulf %129, %134 : vector<8x128xf32>
    %136 = arith.truncf %135 : vector<8x128xf32> to vector<8x128xbf16>
    %137 = vector.extract_strided_slice %132 {offsets = [0, 0], sizes = [16, 128], strides = [1, 1]} : vector<16x256xf32> to vector<16x128xf32>
    %138 = arith.truncf %137 : vector<16x128xf32> to vector<16x128xbf16>
    %139 = vector.extract_strided_slice %132 {offsets = [0, 128], sizes = [16, 128], strides = [1, 1]} : vector<16x256xf32> to vector<16x128xf32>
    %140 = arith.truncf %139 : vector<16x128xf32> to vector<16x128xbf16>
    %141 = vector.extract_strided_slice %136 {offsets = [0, 0], sizes = [8, 32], strides = [1, 1]} : vector<8x128xbf16> to vector<8x32xbf16>
    %142 = vector.shape_cast %141 : vector<8x32xbf16> to vector<1x8x32xbf16>
    %143 = vector.extract_strided_slice %138 {offsets = [0, 0], sizes = [16, 32], strides = [1, 1]} : vector<16x128xbf16> to vector<16x32xbf16>
    %144 = vector.shape_cast %143 : vector<16x32xbf16> to vector<1x16x32xbf16>
    %145 = vector.extract_strided_slice %140 {offsets = [0, 0], sizes = [16, 32], strides = [1, 1]} : vector<16x128xbf16> to vector<16x32xbf16>
    %146 = vector.shape_cast %145 : vector<16x32xbf16> to vector<1x16x32xbf16>
    "tpu.trace_start"() <{level = 10 : i32, message = "bqd,bkd->bqk"}> : () -> ()
    %cst_47 = arith.constant dense<0.000000e+00> : vector<1x8x16xf32>
    %147 = tpu.matmul %142, %144, %cst_47 {dimension_numbers = #tpu.dot_dimension_numbers<[2], [2], [1], [1], [0, 0, 0, 1, 1, 1], [0], [0]>} : vector<1x8x32xbf16>, vector<1x16x32xbf16>, vector<1x8x16xf32> -> vector<1x8x16xf32>
    "tpu.trace_stop"() : () -> ()
    %cst_48 = arith.constant dense<0xFF800000> : vector<1x8xf32>
    %148 = vector.multi_reduction <maximumf>, %147, %cst_48 [2] : vector<1x8x16xf32> to vector<1x8xf32>
    %149 = vector.shape_cast %148 : vector<1x8xf32> to vector<1x8x1xf32>
    %150 = vector.broadcast %149 : vector<1x8x1xf32> to vector<1x8x16xf32>
    %151 = arith.subf %147, %150 : vector<1x8x16xf32>
    %152 = math.exp %151 : vector<1x8x16xf32>
    %cst_49 = arith.constant dense<0.000000e+00> : vector<1x8xf32>
    %153 = vector.multi_reduction <add>, %152, %cst_49 [2] : vector<1x8x16xf32> to vector<1x8xf32>
    %154 = vector.shape_cast %153 : vector<1x8xf32> to vector<1x8x1xf32>
    %155 = tpu.reciprocal %154 {approx = true} : vector<1x8x1xf32> -> vector<1x8x1xf32>
    %156 = vector.broadcast %155 : vector<1x8x1xf32> to vector<1x8x16xf32>
    %157 = arith.mulf %152, %156 : vector<1x8x16xf32>
    %158 = arith.truncf %157 : vector<1x8x16xf32> to vector<1x8x16xbf16>
    "tpu.trace_start"() <{level = 10 : i32, message = "bqk,bkd->bqd"}> : () -> ()
    %cst_50 = arith.constant dense<0.000000e+00> : vector<1x8x32xf32>
    %159 = tpu.matmul %158, %146, %cst_50 {dimension_numbers = #tpu.dot_dimension_numbers<[2], [1], [1], [2], [0, 0, 0, 1, 1, 2], [0], [0]>} : vector<1x8x16xbf16>, vector<1x16x32xbf16>, vector<1x8x32xf32> -> vector<1x8x32xf32>
    "tpu.trace_stop"() : () -> ()
    %160 = vector.shape_cast %159 : vector<1x8x32xf32> to vector<8x32xf32>
    %161 = vector.extract_strided_slice %136 {offsets = [0, 32], sizes = [8, 32], strides = [1, 1]} : vector<8x128xbf16> to vector<8x32xbf16>
    %162 = vector.shape_cast %161 : vector<8x32xbf16> to vector<1x8x32xbf16>
    %163 = vector.extract_strided_slice %138 {offsets = [0, 32], sizes = [16, 32], strides = [1, 1]} : vector<16x128xbf16> to vector<16x32xbf16>
    %164 = vector.shape_cast %163 : vector<16x32xbf16> to vector<1x16x32xbf16>
    %165 = vector.extract_strided_slice %140 {offsets = [0, 32], sizes = [16, 32], strides = [1, 1]} : vector<16x128xbf16> to vector<16x32xbf16>
    %166 = vector.shape_cast %165 : vector<16x32xbf16> to vector<1x16x32xbf16>
    "tpu.trace_start"() <{level = 10 : i32, message = "bqd,bkd->bqk"}> : () -> ()
    %cst_51 = arith.constant dense<0.000000e+00> : vector<1x8x16xf32>
    %167 = tpu.matmul %162, %164, %cst_51 {dimension_numbers = #tpu.dot_dimension_numbers<[2], [2], [1], [1], [0, 0, 0, 1, 1, 1], [0], [0]>} : vector<1x8x32xbf16>, vector<1x16x32xbf16>, vector<1x8x16xf32> -> vector<1x8x16xf32>
    "tpu.trace_stop"() : () -> ()
    %cst_52 = arith.constant dense<0xFF800000> : vector<1x8xf32>
    %168 = vector.multi_reduction <maximumf>, %167, %cst_52 [2] : vector<1x8x16xf32> to vector<1x8xf32>
    %169 = vector.shape_cast %168 : vector<1x8xf32> to vector<1x8x1xf32>
    %170 = vector.broadcast %169 : vector<1x8x1xf32> to vector<1x8x16xf32>
    %171 = arith.subf %167, %170 : vector<1x8x16xf32>
    %172 = math.exp %171 : vector<1x8x16xf32>
    %cst_53 = arith.constant dense<0.000000e+00> : vector<1x8xf32>
    %173 = vector.multi_reduction <add>, %172, %cst_53 [2] : vector<1x8x16xf32> to vector<1x8xf32>
    %174 = vector.shape_cast %173 : vector<1x8xf32> to vector<1x8x1xf32>
    %175 = tpu.reciprocal %174 {approx = true} : vector<1x8x1xf32> -> vector<1x8x1xf32>
    %176 = vector.broadcast %175 : vector<1x8x1xf32> to vector<1x8x16xf32>
    %177 = arith.mulf %172, %176 : vector<1x8x16xf32>
    %178 = arith.truncf %177 : vector<1x8x16xf32> to vector<1x8x16xbf16>
    "tpu.trace_start"() <{level = 10 : i32, message = "bqk,bkd->bqd"}> : () -> ()
    %cst_54 = arith.constant dense<0.000000e+00> : vector<1x8x32xf32>
    %179 = tpu.matmul %178, %166, %cst_54 {dimension_numbers = #tpu.dot_dimension_numbers<[2], [1], [1], [2], [0, 0, 0, 1, 1, 2], [0], [0]>} : vector<1x8x16xbf16>, vector<1x16x32xbf16>, vector<1x8x32xf32> -> vector<1x8x32xf32>
    "tpu.trace_stop"() : () -> ()
    %180 = vector.shape_cast %179 : vector<1x8x32xf32> to vector<8x32xf32>
    %181 = vector.extract_strided_slice %136 {offsets = [0, 64], sizes = [8, 32], strides = [1, 1]} : vector<8x128xbf16> to vector<8x32xbf16>
    %182 = vector.shape_cast %181 : vector<8x32xbf16> to vector<1x8x32xbf16>
    %183 = vector.extract_strided_slice %138 {offsets = [0, 64], sizes = [16, 32], strides = [1, 1]} : vector<16x128xbf16> to vector<16x32xbf16>
    %184 = vector.shape_cast %183 : vector<16x32xbf16> to vector<1x16x32xbf16>
    %185 = vector.extract_strided_slice %140 {offsets = [0, 64], sizes = [16, 32], strides = [1, 1]} : vector<16x128xbf16> to vector<16x32xbf16>
    %186 = vector.shape_cast %185 : vector<16x32xbf16> to vector<1x16x32xbf16>
    "tpu.trace_start"() <{level = 10 : i32, message = "bqd,bkd->bqk"}> : () -> ()
    %cst_55 = arith.constant dense<0.000000e+00> : vector<1x8x16xf32>
    %187 = tpu.matmul %182, %184, %cst_55 {dimension_numbers = #tpu.dot_dimension_numbers<[2], [2], [1], [1], [0, 0, 0, 1, 1, 1], [0], [0]>} : vector<1x8x32xbf16>, vector<1x16x32xbf16>, vector<1x8x16xf32> -> vector<1x8x16xf32>
    "tpu.trace_stop"() : () -> ()
    %cst_56 = arith.constant dense<0xFF800000> : vector<1x8xf32>
    %188 = vector.multi_reduction <maximumf>, %187, %cst_56 [2] : vector<1x8x16xf32> to vector<1x8xf32>
    %189 = vector.shape_cast %188 : vector<1x8xf32> to vector<1x8x1xf32>
    %190 = vector.broadcast %189 : vector<1x8x1xf32> to vector<1x8x16xf32>
    %191 = arith.subf %187, %190 : vector<1x8x16xf32>
    %192 = math.exp %191 : vector<1x8x16xf32>
    %cst_57 = arith.constant dense<0.000000e+00> : vector<1x8xf32>
    %193 = vector.multi_reduction <add>, %192, %cst_57 [2] : vector<1x8x16xf32> to vector<1x8xf32>
    %194 = vector.shape_cast %193 : vector<1x8xf32> to vector<1x8x1xf32>
    %195 = tpu.reciprocal %194 {approx = true} : vector<1x8x1xf32> -> vector<1x8x1xf32>
    %196 = vector.broadcast %195 : vector<1x8x1xf32> to vector<1x8x16xf32>
    %197 = arith.mulf %192, %196 : vector<1x8x16xf32>
    %198 = arith.truncf %197 : vector<1x8x16xf32> to vector<1x8x16xbf16>
    "tpu.trace_start"() <{level = 10 : i32, message = "bqk,bkd->bqd"}> : () -> ()
    %cst_58 = arith.constant dense<0.000000e+00> : vector<1x8x32xf32>
    %199 = tpu.matmul %198, %186, %cst_58 {dimension_numbers = #tpu.dot_dimension_numbers<[2], [1], [1], [2], [0, 0, 0, 1, 1, 2], [0], [0]>} : vector<1x8x16xbf16>, vector<1x16x32xbf16>, vector<1x8x32xf32> -> vector<1x8x32xf32>
    "tpu.trace_stop"() : () -> ()
    %200 = vector.shape_cast %199 : vector<1x8x32xf32> to vector<8x32xf32>
    %201 = vector.extract_strided_slice %136 {offsets = [0, 96], sizes = [8, 32], strides = [1, 1]} : vector<8x128xbf16> to vector<8x32xbf16>
    %202 = vector.shape_cast %201 : vector<8x32xbf16> to vector<1x8x32xbf16>
    %203 = vector.extract_strided_slice %138 {offsets = [0, 96], sizes = [16, 32], strides = [1, 1]} : vector<16x128xbf16> to vector<16x32xbf16>
    %204 = vector.shape_cast %203 : vector<16x32xbf16> to vector<1x16x32xbf16>
    %205 = vector.extract_strided_slice %140 {offsets = [0, 96], sizes = [16, 32], strides = [1, 1]} : vector<16x128xbf16> to vector<16x32xbf16>
    %206 = vector.shape_cast %205 : vector<16x32xbf16> to vector<1x16x32xbf16>
    "tpu.trace_start"() <{level = 10 : i32, message = "bqd,bkd->bqk"}> : () -> ()
    %cst_59 = arith.constant dense<0.000000e+00> : vector<1x8x16xf32>
    %207 = tpu.matmul %202, %204, %cst_59 {dimension_numbers = #tpu.dot_dimension_numbers<[2], [2], [1], [1], [0, 0, 0, 1, 1, 1], [0], [0]>} : vector<1x8x32xbf16>, vector<1x16x32xbf16>, vector<1x8x16xf32> -> vector<1x8x16xf32>
    "tpu.trace_stop"() : () -> ()
    %cst_60 = arith.constant dense<0xFF800000> : vector<1x8xf32>
    %208 = vector.multi_reduction <maximumf>, %207, %cst_60 [2] : vector<1x8x16xf32> to vector<1x8xf32>
    %209 = vector.shape_cast %208 : vector<1x8xf32> to vector<1x8x1xf32>
    %210 = vector.broadcast %209 : vector<1x8x1xf32> to vector<1x8x16xf32>
    %211 = arith.subf %207, %210 : vector<1x8x16xf32>
    %212 = math.exp %211 : vector<1x8x16xf32>
    %cst_61 = arith.constant dense<0.000000e+00> : vector<1x8xf32>
    %213 = vector.multi_reduction <add>, %212, %cst_61 [2] : vector<1x8x16xf32> to vector<1x8xf32>
    %214 = vector.shape_cast %213 : vector<1x8xf32> to vector<1x8x1xf32>
    %215 = tpu.reciprocal %214 {approx = true} : vector<1x8x1xf32> -> vector<1x8x1xf32>
    %216 = vector.broadcast %215 : vector<1x8x1xf32> to vector<1x8x16xf32>
    %217 = arith.mulf %212, %216 : vector<1x8x16xf32>
    %218 = arith.truncf %217 : vector<1x8x16xf32> to vector<1x8x16xbf16>
    "tpu.trace_start"() <{level = 10 : i32, message = "bqk,bkd->bqd"}> : () -> ()
    %cst_62 = arith.constant dense<0.000000e+00> : vector<1x8x32xf32>
    %219 = tpu.matmul %218, %206, %cst_62 {dimension_numbers = #tpu.dot_dimension_numbers<[2], [1], [1], [2], [0, 0, 0, 1, 1, 2], [0], [0]>} : vector<1x8x16xbf16>, vector<1x16x32xbf16>, vector<1x8x32xf32> -> vector<1x8x32xf32>
    "tpu.trace_stop"() : () -> ()
    %220 = vector.shape_cast %219 : vector<1x8x32xf32> to vector<8x32xf32>
    %221 = tpu.concatenate %160, %180, %200, %220 in 1 : vector<8x32xf32>, vector<8x32xf32>, vector<8x32xf32>, vector<8x32xf32> -> vector<8x128xf32>
    %222 = arith.truncf %221 : vector<8x128xf32> to vector<8x128xbf16>
    %c0_63 = arith.constant 0 : index
    %c0_64 = arith.constant 0 : index
    %223 = vector.load %arg10[%c0_63, %c0_64] : memref<128x128xbf16, #tpu.memory_space<vmem>>, vector<128x128xbf16>
    %cst_65 = arith.constant dense<0.000000e+00> : vector<8x128xf32>
    %224 = tpu.matmul %222, %223, %cst_65 {dimension_numbers = #tpu.dot_dimension_numbers<[1], [0], [0], [1], [0, 0, 1, 1], [], []>} : vector<8x128xbf16>, vector<128x128xbf16>, vector<8x128xf32> -> vector<8x128xf32>
    %225 = vector.broadcast %133 : vector<1x128xf32> to vector<8x128xf32>
    %226 = arith.addf %224, %225 : vector<8x128xf32>
    %227 = arith.addf %126, %226 : vector<8x128xf32>
    %c0_66 = arith.constant 0 : index
    %c0_67 = arith.constant 0 : index
    %228 = vector.load %arg12[%c0_66, %c0_67] : memref<1x128xf32, #tpu.memory_space<vmem>>, vector<1x128xf32>
    %c0_68 = arith.constant 0 : index
    %c0_69 = arith.constant 0 : index
    %229 = vector.load %arg13[%c0_68, %c0_69] : memref<1x128xf32, #tpu.memory_space<vmem>>, vector<1x128xf32>
    %cst_70 = arith.constant dense<0.000000e+00> : vector<8xf32>
    %230 = vector.multi_reduction <add>, %227, %cst_70 [1] : vector<8x128xf32> to vector<8xf32>
    %231 = vector.shape_cast %230 : vector<8xf32> to vector<8x1xf32>
    %cst_71 = arith.constant 1.280000e+02 : f32
    %232 = vector.broadcast %cst_71 : f32 to vector<8x1xf32>
    %233 = arith.divf %231, %232 : vector<8x1xf32>
    %234 = vector.broadcast %233 : vector<8x1xf32> to vector<8x128xf32>
    %235 = arith.subf %227, %234 : vector<8x128xf32>
    %236 = arith.mulf %235, %235 : vector<8x128xf32>
    %cst_72 = arith.constant dense<0.000000e+00> : vector<8xf32>
    %237 = vector.multi_reduction <add>, %236, %cst_72 [1] : vector<8x128xf32> to vector<8xf32>
    %238 = vector.shape_cast %237 : vector<8xf32> to vector<8x1xf32>
    %cst_73 = arith.constant 0.00787401571 : f32
    %239 = vector.broadcast %cst_73 : f32 to vector<8x1xf32>
    %240 = arith.mulf %238, %239 : vector<8x1xf32>
    %241 = math.sqrt %240 : vector<8x1xf32>
    %cst_74 = arith.constant 1.000000e-10 : f32
    %242 = vector.broadcast %cst_74 : f32 to vector<8x1xf32>
    %243 = arith.addf %241, %242 : vector<8x1xf32>
    %244 = tpu.reciprocal %243 {approx = true} : vector<8x1xf32> -> vector<8x1xf32>
    %245 = vector.broadcast %244 : vector<8x1xf32> to vector<8x128xf32>
    %246 = arith.mulf %235, %245 : vector<8x128xf32>
    %247 = vector.broadcast %228 : vector<1x128xf32> to vector<8x128xf32>
    %248 = arith.mulf %246, %247 : vector<8x128xf32>
    %249 = vector.broadcast %229 : vector<1x128xf32> to vector<8x128xf32>
    %250 = arith.addf %248, %249 : vector<8x128xf32>
    %251 = arith.truncf %250 : vector<8x128xf32> to vector<8x128xbf16>
    %c0_75 = arith.constant 0 : index
    %c0_76 = arith.constant 0 : index
    %252 = vector.load %arg14[%c0_75, %c0_76] : memref<128x256xbf16, #tpu.memory_space<vmem>>, vector<128x256xbf16>
    %c0_77 = arith.constant 0 : index
    %c0_78 = arith.constant 0 : index
    %253 = vector.load %arg16[%c0_77, %c0_78] : memref<256x128xbf16, #tpu.memory_space<vmem>>, vector<256x128xbf16>
    %c0_79 = arith.constant 0 : index
    %c0_80 = arith.constant 0 : index
    %254 = vector.load %arg15[%c0_79, %c0_80] : memref<1x256xf32, #tpu.memory_space<vmem>>, vector<1x256xf32>
    %cst_81 = arith.constant dense<0.000000e+00> : vector<8x256xf32>
    %255 = tpu.matmul %251, %252, %cst_81 {dimension_numbers = #tpu.dot_dimension_numbers<[1], [0], [0], [1], [0, 0, 1, 1], [], []>} : vector<8x128xbf16>, vector<128x256xbf16>, vector<8x256xf32> -> vector<8x256xf32>
    %256 = vector.broadcast %254 : vector<1x256xf32> to vector<8x256xf32>
    %257 = arith.addf %255, %256 : vector<8x256xf32>
    %cst_82 = arith.constant 0.000000e+00 : f32
    %258 = vector.broadcast %cst_82 : f32 to vector<8x256xf32>
    %259 = arith.maximumf %257, %258 : vector<8x256xf32>
    %260 = arith.truncf %259 : vector<8x256xf32> to vector<8x256xbf16>
    %cst_83 = arith.constant dense<0.000000e+00> : vector<8x128xf32>
    %261 = tpu.matmul %260, %253, %cst_83 {dimension_numbers = #tpu.dot_dimension_numbers<[1], [0], [0], [1], [0, 0, 1, 1], [], []>} : vector<8x256xbf16>, vector<256x128xbf16>, vector<8x128xf32> -> vector<8x128xf32>
    %262 = arith.addf %250, %261 : vector<8x128xf32>
    %c0_84 = arith.constant 0 : index
    %c0_85 = arith.constant 0 : index
    %263 = vector.load %arg17[%c0_84, %c0_85] : memref<1x128xf32, #tpu.memory_space<vmem>>, vector<1x128xf32>
    %264 = vector.broadcast %263 : vector<1x128xf32> to vector<8x128xf32>
    %265 = arith.addf %262, %264 : vector<8x128xf32>
    %c0_86 = arith.constant 0 : index
    %c0_87 = arith.constant 0 : index
    %266 = vector.load %arg18[%c0_86, %c0_87] : memref<1x128xf32, #tpu.memory_space<vmem>>, vector<1x128xf32>
    %c0_88 = arith.constant 0 : index
    %c0_89 = arith.constant 0 : index
    %267 = vector.load %arg19[%c0_88, %c0_89] : memref<1x128xf32, #tpu.memory_space<vmem>>, vector<1x128xf32>
    %cst_90 = arith.constant dense<0.000000e+00> : vector<8xf32>
    %268 = vector.multi_reduction <add>, %265, %cst_90 [1] : vector<8x128xf32> to vector<8xf32>
    %269 = vector.shape_cast %268 : vector<8xf32> to vector<8x1xf32>
    %cst_91 = arith.constant 1.280000e+02 : f32
    %270 = vector.broadcast %cst_91 : f32 to vector<8x1xf32>
    %271 = arith.divf %269, %270 : vector<8x1xf32>
    %272 = vector.broadcast %271 : vector<8x1xf32> to vector<8x128xf32>
    %273 = arith.subf %265, %272 : vector<8x128xf32>
    %274 = arith.mulf %273, %273 : vector<8x128xf32>
    %cst_92 = arith.constant dense<0.000000e+00> : vector<8xf32>
    %275 = vector.multi_reduction <add>, %274, %cst_92 [1] : vector<8x128xf32> to vector<8xf32>
    %276 = vector.shape_cast %275 : vector<8xf32> to vector<8x1xf32>
    %cst_93 = arith.constant 0.00787401571 : f32
    %277 = vector.broadcast %cst_93 : f32 to vector<8x1xf32>
    %278 = arith.mulf %276, %277 : vector<8x1xf32>
    %279 = math.sqrt %278 : vector<8x1xf32>
    %cst_94 = arith.constant 1.000000e-10 : f32
    %280 = vector.broadcast %cst_94 : f32 to vector<8x1xf32>
    %281 = arith.addf %279, %280 : vector<8x1xf32>
    %282 = tpu.reciprocal %281 {approx = true} : vector<8x1xf32> -> vector<8x1xf32>
    %283 = vector.broadcast %282 : vector<8x1xf32> to vector<8x128xf32>
    %284 = arith.mulf %273, %283 : vector<8x128xf32>
    %285 = vector.broadcast %266 : vector<1x128xf32> to vector<8x128xf32>
    %286 = arith.mulf %284, %285 : vector<8x128xf32>
    %287 = vector.broadcast %267 : vector<1x128xf32> to vector<8x128xf32>
    %288 = arith.addf %286, %287 : vector<8x128xf32>
    %289 = vector.shape_cast %288 : vector<8x128xf32> to vector<1x8x128xf32>
    %c0_95 = arith.constant 0 : index
    %c0_96 = arith.constant 0 : index
    %c0_97 = arith.constant 0 : index
    %290 = vector.load %arg20[%c0_95, %c0_96, %c0_97] : memref<1x8x128xf32, #tpu.memory_space<vmem>>, vector<1x8x128xf32>
    tpu.vector_store %arg20[%c0_95, %c0_96, %c0_97], %289 {strides = array<i32>} : memref<1x8x128xf32, #tpu.memory_space<vmem>>, vector<1x8x128xf32>,
    return
  }
  func.func @transform_0(%arg0: i32) -> (i32, i32, i32) {
    %c0_i32 = arith.constant 0 : i32
    %c0_i32_0 = arith.constant 0 : i32
    %c0_i32_1 = arith.constant 0 : i32
    return %arg0, %c0_i32, %c0_i32_0 : i32, i32, i32
  }
  func.func @transform_1(%arg0: i32) -> (i32, i32, i32) {
    %c0_i32 = arith.constant 0 : i32
    %c0_i32_0 = arith.constant 0 : i32
    %c0_i32_1 = arith.constant 0 : i32
    return %arg0, %c0_i32, %c0_i32_0 : i32, i32, i32
  }
  func.func @transform_2(%arg0: i32) -> (i32, i32) {
    %c0_i32 = arith.constant 0 : i32
    %c0_i32_0 = arith.constant 0 : i32
    %c0_i32_1 = arith.constant 0 : i32
    return %c0_i32, %c0_i32_0 : i32, i32
  }
  func.func @transform_3(%arg0: i32) -> (i32, i32) {
    %c0_i32 = arith.constant 0 : i32
    %c0_i32_0 = arith.constant 0 : i32
    %c0_i32_1 = arith.constant 0 : i32
    return %c0_i32, %c0_i32_0 : i32, i32
  }
  func.func @transform_4(%arg0: i32) -> (i32, i32) {
    %c0_i32 = arith.constant 0 : i32
    %c0_i32_0 = arith.constant 0 : i32
    %c0_i32_1 = arith.constant 0 : i32
    return %c0_i32, %c0_i32_0 : i32, i32
  }
  func.func @transform_5(%arg0: i32) -> (i32, i32) {
    %c0_i32 = arith.constant 0 : i32
    %c0_i32_0 = arith.constant 0 : i32
    %c0_i32_1 = arith.constant 0 : i32
    return %c0_i32, %c0_i32_0 : i32, i32
  }
  func.func @transform_6(%arg0: i32) -> (i32, i32) {
    %c0_i32 = arith.constant 0 : i32
    %c0_i32_0 = arith.constant 0 : i32
    %c0_i32_1 = arith.constant 0 : i32
    return %c0_i32, %c0_i32_0 : i32, i32
  }
  func.func @transform_7(%arg0: i32) -> (i32, i32) {
    %c0_i32 = arith.constant 0 : i32
    %c0_i32_0 = arith.constant 0 : i32
    %c0_i32_1 = arith.constant 0 : i32
    return %c0_i32, %c0_i32_0 : i32, i32
  }
  func.func @transform_8(%arg0: i32) -> (i32, i32) {
    %c0_i32 = arith.constant 0 : i32
    %c0_i32_0 = arith.constant 0 : i32
    %c0_i32_1 = arith.constant 0 : i32
    return %c0_i32, %c0_i32_0 : i32, i32
  }
  func.func @transform_9(%arg0: i32) -> (i32, i32) {
    %c0_i32 = arith.constant 0 : i32
    %c0_i32_0 = arith.constant 0 : i32
    %c0_i32_1 = arith.constant 0 : i32
    return %c0_i32, %c0_i32_0 : i32, i32
  }
  func.func @transform_10(%arg0: i32) -> (i32, i32) {
    %c0_i32 = arith.constant 0 : i32
    %c0_i32_0 = arith.constant 0 : i32
    %c0_i32_1 = arith.constant 0 : i32
    return %c0_i32, %c0_i32_0 : i32, i32
  }
  func.func @transform_11(%arg0: i32) -> (i32, i32) {
    %c0_i32 = arith.constant 0 : i32
    %c0_i32_0 = arith.constant 0 : i32
    %c0_i32_1 = arith.constant 0 : i32
    return %c0_i32, %c0_i32_0 : i32, i32
  }
  func.func @transform_12(%arg0: i32) -> (i32, i32) {
    %c0_i32 = arith.constant 0 : i32
    %c0_i32_0 = arith.constant 0 : i32
    %c0_i32_1 = arith.constant 0 : i32
    return %c0_i32, %c0_i32_0 : i32, i32
  }
  func.func @transform_13(%arg0: i32) -> (i32, i32) {
    %c0_i32 = arith.constant 0 : i32
    %c0_i32_0 = arith.constant 0 : i32
    %c0_i32_1 = arith.constant 0 : i32
    return %c0_i32, %c0_i32_0 : i32, i32
  }
  func.func @transform_14(%arg0: i32) -> (i32, i32) {
    %c0_i32 = arith.constant 0 : i32
    %c0_i32_0 = arith.constant 0 : i32
    %c0_i32_1 = arith.constant 0 : i32
    return %c0_i32, %c0_i32_0 : i32, i32
  }
  func.func @transform_15(%arg0: i32) -> (i32, i32) {
    %c0_i32 = arith.constant 0 : i32
    %c0_i32_0 = arith.constant 0 : i32
    %c0_i32_1 = arith.constant 0 : i32
    return %c0_i32, %c0_i32_0 : i32, i32
  }
  func.func @transform_16(%arg0: i32) -> (i32, i32) {
    %c0_i32 = arith.constant 0 : i32
    %c0_i32_0 = arith.constant 0 : i32
    %c0_i32_1 = arith.constant 0 : i32
    return %c0_i32, %c0_i32_0 : i32, i32
  }
  func.func @transform_17(%arg0: i32) -> (i32, i32) {
    %c0_i32 = arith.constant 0 : i32
    %c0_i32_0 = arith.constant 0 : i32
    %c0_i32_1 = arith.constant 0 : i32
    return %c0_i32, %c0_i32_0 : i32, i32
  }
  func.func @transform_18(%arg0: i32) -> (i32, i32) {
    %c0_i32 = arith.constant 0 : i32
    %c0_i32_0 = arith.constant 0 : i32
    %c0_i32_1 = arith.constant 0 : i32
    return %c0_i32, %c0_i32_0 : i32, i32
  }
  func.func @transform_19(%arg0: i32) -> (i32, i32, i32) {
    %c0_i32 = arith.constant 0 : i32
    %c0_i32_0 = arith.constant 0 : i32
    %c0_i32_1 = arith.constant 0 : i32
    return %arg0, %c0_i32, %c0_i32_0 : i32, i32, i32
  }
}

</mosaic_0001>

<bundles_post_ra>
// kernel: tpu_custom_call.1
= control target key start
LH: loop header
LB: loop body
LE: loop exit
PB: predicated region body
PF: predicated region fallthrough
CT: control target
= control target key end

     0   :  { %s3993_s0 = inlined_call_operand.hbm [shape: f32[2,8,128], index: 0, kind: input, shape index: {}]   ;;  %s3994_s1 = inlined_call_operand.hbm [shape: f32[2,16,128], index: 1, kind: input, shape index: {}]   ;;  %s3995_s2 = inlined_call_operand.hbm [shape: bf16[128,384], index: 2, kind: input, shape index: {}]   ;;  %s3996_s3 = inlined_call_operand.hbm [shape: bf16[128,128], index: 3, kind: input, shape index: {}]   ;;  %s3997_s4 = inlined_call_operand.vmem [shape: f32[1,128], index: 4, kind: input, shape index: {}]   ;;  %s3998_s5 = inlined_call_operand.vmem [shape: f32[1,128], index: 5, kind: input, shape index: {}]   ;;  %s3999_s6 = inlined_call_operand.vmem [shape: f32[1,128], index: 6, kind: input, shape index: {}]   ;;  %s4000_s7 = inlined_call_operand.hbm [shape: bf16[128,128], index: 7, kind: input, shape index: {}]   ;;  %s4001_s8 = inlined_call_operand.hbm [shape: bf16[128,256], index: 8, kind: input, shape index: {}]   ;;  %s4002_s9 = inlined_call_operand.hbm [shape: bf16[128,128], index: 9, kind: input, shape index: {}]   ;;  %s4003_s10 = inlined_call_operand.vmem [shape: f32[1,128], index: 10, kind: input, shape index: {}]   ;;  %s4004_s11 = inlined_call_operand.vmem [shape: f32[1,128], index: 11, kind: input, shape index: {}]   ;;  %s4005_s12 = inlined_call_operand.vmem [shape: f32[1,128], index: 12, kind: input, shape index: {}]   ;;  %s4006_s13 = inlined_call_operand.hbm [shape: bf16[128,256], index: 13, kind: input, shape index: {}]   ;;  %s4007_s14 = inlined_call_operand.vmem [shape: f32[1,256], index: 14, kind: input, shape index: {}]   ;;  %s4008_s15 = inlined_call_operand.hbm [shape: bf16[256,128], index: 15, kind: input, shape index: {}]   ;;  %s4009_s16 = inlined_call_operand.vmem [shape: f32[1,128], index: 16, kind: input, shape index: {}]   ;;  %s4010_s17 = inlined_call_operand.vmem [shape: f32[1,128], index: 17, kind: input, shape index: {}]   ;;  %s4011_s18 = inlined_call_operand.vmem [shape: f32[1,128], index: 18, kind: input, shape index: {}]   ;;  %s4012_s19 = inlined_call_operand.hbm [shape: f32[2,8,128], index: 19, kind: output, shape index: {}]  }
   0x1   :  { %4021 = sst [smem:[#allocation28_spill]] %s3993_s0 }
   0x2   :  { %4022 = sst [smem:[#allocation29_spill]] %s3994_s1 }
   0x3   :  { %4023 = sst [smem:[#allocation30_spill]] %s3995_s2 }
   0x4   :  { %4024 = sst [smem:[#allocation31_spill]] %s3996_s3 }
   0x5   :  { %4025 = sst [smem:[#allocation32_spill]] %s4000_s7 }
   0x6   :  { %4026 = sst [smem:[#allocation33_spill]] %s4001_s8 }
   0x7   :  { %4027 = sst [smem:[#allocation34_spill]] %s4002_s9 }
   0x8   :  { %4028 = sst [smem:[#allocation35_spill]] %s4004_s11 }
   0x9   :  { %4029 = sst [smem:[#allocation36_spill]] %s4005_s12 }
   0xa   :  { %4030 = sst [smem:[#allocation37_spill]] %s4006_s13 }
   0xb   :  { %4031 = sst [smem:[#allocation38_spill]] %s4007_s14 }
   0xc   :  { %4032 = sst [smem:[#allocation39_spill]] %s4008_s15 }
   0xd   :  { %4033 = sst [smem:[#allocation40_spill]] %s4009_s16 }
   0xe   :  { %4034 = sst [smem:[#allocation41_spill]] %s4010_s17 }
   0xf   :  { %4035 = sst [smem:[#allocation42_spill]] %s4011_s18 }
  0x10   :  { %4036 = sst [smem:[#allocation43_spill]] %s4012_s19 }
  0x11   :  { %24 = vsyncpa [#allocation3], 0 }
  0x12   :  { %26 = vsyncpa [#allocation3 + $0x1], 0 }
  0x13   :  { %27 = vsyncpa [#allocation6], 0 }
  0x14   :  { %29 = vsyncpa [#allocation6 + $0x1], 0 }
  0x15   :  { %30 = vsyncpa [#allocation9], 0 }
  0x16   :  { %31 = vsyncpa [#allocation12], 0 }
  0x17   :  { %32 = vsyncpa [#allocation15], 0 }
  0x18   :  { %33 = vsyncpa [#allocation4], 0 }
  0x19   :  { %35 = vsyncpa [#allocation4 + $0x1], 0  ;;  %s3610_s0 = smov 0   ;;  %s3612_s30 = smov 0  }
  0x1a   :  { %s3614_s20 = smov 0   ;;  %s3616_s21 = smov 0  }
  0x1b LB: > { %4037 = sst [smem:[#allocation25_spill]] %s3487_s20  ;;  %s3634_s24 = sadd.s32 4294967295, %s3491_s21   ;;  %s3491_s21 = sphi %s3616_s21, %s4066_s21   ;;  %s3487_s20 = sphi %s3614_s20, %s4068_s20   ;;  %s3483_s30 = sphi %s3612_s30, %s4070_s30   ;;  %s3479_s0 = sphi %s3610_s0, %s4069_s0  }
  0x1c   : > { %s4038_s2 = sld [smem:[#allocation30_spill]]  ;;  %p2422_p0 = scmp.ge.s32.totalorder %s3491_s21, 1 }
  0x1d   : > { %p62_p1 = scmp.eq.s32.totalorder %s3634_s24, 0  ;;  %p481_p2 = scmp.lt.s32.totalorder %s3491_s21, 3 }
  0x1e   : > { %s3493_s3 = smov [#allocation7]   ;;  %s4040_s29 = sld [smem:[#allocation31_spill]] }
  0x1f   : > { %p3639_p3 = pnand %p2422_p0, %p481_p2  ;;  %s494_s26 = sshll.u32 %s3493_s3, 4  ;;  %s495_s26 = int_to_ptr.vmem [resolvable:$true] %s494_s26 }
  0x20   : > { %s3495_s3 = smov 192   ;;  %s3496_s19 = smov 12  }
  0x21   : > { %p2982_p4 = pneg %p3639_p3  ;;  %s3497_s17 = smov 64  }
  0x22   : > { %s492_s23 = sshll.u32 %s4038_s2, 4  ;;  %s3494_s2 = smov [#allocation8]   ;;  %s493_s23 = int_to_ptr.hbm [resolvable:$true] %s492_s23 }
  0x23   : > { %p3651_p6 = pnand %p2982_p4, %p62_p1  ;;  %s508_s18 = sshll.u32 %s3494_s2, 4  ;;  %s509_s18 = int_to_ptr.vmem [resolvable:$true] %s508_s18 }
  0x24   : > { %s506_s1 = sshll.u32 %s4040_s29, 4  ;;  %s3498_s16 = smov 4   ;;  %s507_s1 = int_to_ptr.hbm [resolvable:$true] %s506_s1 }
  0x25   : > { %2985 = dma.hbm_to_vmem [thread:$0]  (!%p3651_p6), %s493_s23, 3072, %s495_s26, [#allocation6], %s3495_s3, %s3495_s3, %s3496_s19  }
  0x26   : > { %2988 = dma.hbm_to_vmem [thread:$0]  (!%p3651_p6), %s507_s1, 1024, %s509_s18, [#allocation9], %s3497_s17, %s3497_s17, %s3498_s16  }
  0x27   : > { %s4042_s8 = sld [smem:[#allocation33_spill]]  ;;  %s3499_s2 = smov [#allocation11]  }
  0x28   : > { %s545_s14 = sshll.u32 %s3499_s2, 4  ;;  %s4043_s13 = sld [smem:[#allocation37_spill]]  ;;  %s546_s14 = int_to_ptr.vmem [resolvable:$true] %s545_s14 }
  0x29   : > { %s4016_s23 = smov 128   ;;  %s4017_s26 = smov 8  }
  0x2a   : > { %s3502_s18 = smov [#allocation14]   ;;  %s4044_s7 = sld [smem:[#allocation32_spill]] }
  0x2b   : > { %s582_s1 = sshll.u32 %s3502_s18, 4  ;;  %s4045_s9 = sld [smem:[#allocation34_spill]]  ;;  %s583_s1 = int_to_ptr.vmem [resolvable:$true] %s582_s1 }
  0x2c   : > { %s4046_s15 = sld [smem:[#allocation39_spill]]  ;;  %s2421_s12 = sadd.s32 4294967294, %s3491_s21  }
  0x2d   : > { %s543_s29 = sshll.u32 %s4042_s8, 4  ;;  %p55_p7 = scmp.ne.s32.totalorder %s3487_s20, %s3483_s30  ;;  %s544_s29 = int_to_ptr.hbm [resolvable:$true] %s543_s29 }
  0x2e   : > { %s580_s19 = sshll.u32 %s4043_s13, 4  ;;  %p56_p9 = scmp.eq.s32.totalorder %s3491_s21, 0  ;;  %s581_s19 = int_to_ptr.hbm [resolvable:$true] %s580_s19 }
  0x2f   : > { %2994 = dma.hbm_to_vmem [thread:$0]  (!%p3651_p6), %s544_s29, 2048, %s546_s14, [#allocation12], %s4016_s23, %s4016_s23, %s4017_s26  }
  0x30   : > { %s529_s28 = sshll.u32 %s4044_s7, 4  ;;  %s3503_s29 = smov [#allocation10]   ;;  %s530_s28 = int_to_ptr.hbm [resolvable:$true] %s529_s28 }
  0x31   : > { %3000 = dma.hbm_to_vmem [thread:$0]  (!%p3651_p6), %s581_s19, 2048, %s583_s1, [#allocation15], %s4016_s23, %s4016_s23, %s4017_s26  }
  0x32   : > { %s557_s14 = sshll.u32 %s4045_s9, 4  ;;  %s531_s2 = sshll.u32 %s3503_s29, 4  ;;  %s558_s14 = int_to_ptr.hbm [resolvable:$true] %s557_s14  ;;  %s532_s2 = int_to_ptr.vmem [resolvable:$true] %s531_s2 }
  0x33   : > { %2991 = dma.hbm_to_vmem [thread:$0]  (!%p3651_p6), %s530_s28, 1024, %s532_s2, [#allocation9], %s3497_s17, %s3497_s17, %s3498_s16  }
  0x34   : > { %s3504_s19 = smov [#allocation13]   ;;  %s597_s27 = sshll.u32 %s4046_s15, 4  ;;  %s598_s27 = int_to_ptr.hbm [resolvable:$true] %s597_s27 }
  0x35   : > { %s559_s18 = sshll.u32 %s3504_s19, 4  ;;  %s3505_s28 = smov [#allocation16]   ;;  %s560_s18 = int_to_ptr.vmem [resolvable:$true] %s559_s18 }
  0x36   : > { %2997 = dma.hbm_to_vmem [thread:$0]  (!%p3651_p6), %s558_s14, 1024, %s560_s18, [#allocation12], %s3497_s17, %s3497_s17, %s3498_s16  }
  0x37   : > { %s599_s11 = sshll.u32 %s3505_s28, 4  ;;  %s3704_s29 = sadd.s32 1, %s3491_s21   ;;  %s600_s11 = int_to_ptr.vmem [resolvable:$true] %s599_s11 }
  0x38   : > { %3003 = dma.hbm_to_vmem [thread:$0]  (!%p3651_p6), %s598_s27, 2048, %s600_s11, [#allocation15], %s3497_s17, %s3497_s17, %s3498_s16  }
  0x39   : > { %4047 = sst [smem:[#allocation26_spill]] %s3704_s29  ;;  %s48_s2 = sadd.s32 1, %s3487_s20 }
  0x3a   : > { %s45_s19 = ssub.s32 %s3491_s21, %s3704_s29  ;;  %p61_p10 = scmp.ne.s32.totalorder %s3483_s30, %s3479_s0 }
  0x3b   : > { %p46_p8 = scmp.eq.s32.totalorder %s45_s19, 0  ;;  %p468_p11 = scmp.eq.s32.totalorder %s3634_s24, 1 }
  0x3c   : > { %p3718_p12 = por %p56_p9, %p55_p7  ;;  %p3724_p13 = por %p62_p1, %p61_p10 }
  0x3d   : > { %s3716_s14 = scalar_select %p46_p8, %s3487_s20, %s48_s2  }
  0x3e   : > { %p3728_p0 = por %p468_p11, %p55_p7  ;;  %p474_p2 = scmp.eq.s32.totalorder %s2421_s12, 1 }
  0x3f   : > { %4048 = sst [smem:[#allocation27_spill]] %s3716_s14  ;;  %p3022_p4 = scmp.lt.s32.totalorder %s3491_s21, 2 }
  0x40   : > { %s3734_s18 = sand.u32 1, %s3487_s20   ;;  %p3736_p6 = por %p474_p2, %p61_p10 }
  0x41   : > { %s2431_s3 = sshll.u32 %s3734_s18, 3  ;;  %s2432_s27 = sshll.u32 %s3491_s21, 3 }
  0x42   : > { %s4053_s2 = sld [smem:[#allocation28_spill]]  ;;  %s626_s26 = scalar_lea.vmem [#allocation2], %s2431_s3 }
  0x43   : > { %s634_s7 = sshll.u32 %s626_s26, 4  ;;  %p3747_p7 = pnand %p3022_p4, %p3718_p12  ;;  %s635_s7 = int_to_ptr.vmem [resolvable:$true] %s634_s7 }
  0x44   : > { %s2433_s8 = sshll.u32 %s3734_s18, 4  ;;  %s641_s9 = sand.u32 1, %s3491_s21  }
  0x45   : > { %s645_s13 = scalar_lea.vmem [#allocation5], %s2433_s8  ;;  %s623_s14 = scalar_lea.sflag [#allocation3], %s3734_s18 }
  0x46   : > { %s653_s15 = sshll.u32 %s645_s13, 4  ;;  %p3349_p9 = pneg %p3747_p7  ;;  %s654_s15 = int_to_ptr.vmem [resolvable:$true] %s653_s15 }
  0x48   : > { %s630_s19 = scalar_lea.hbm %s4053_s2, %s2432_s27  ;;  %s3352_s3 = scalar_lea.hbm %s4053_s2, 16 }
  0x49   : > { %s632_s23 = sshll.u32 %s630_s19, 4  ;;  %s633_s23 = int_to_ptr.hbm [resolvable:$true] %s632_s23 }
  0x4a   : > { %s3345_s20 = sshra.s32 %s633_s23, 4  ;;  %s3346_s20 = int_to_ptr.hbm [resolvable:$true] %s3345_s20 }
  0x4b   : > { %s3347_s27 = scalar_lea.hbm %s3346_s20, 8  ;;  %p3353_p12 = scmp.lt.s32.totalorder %s3346_s20, %s4053_s2 }
  0x4c   : > { %p3348_p8 = scmp.ne.s32.totalorder %s3346_s20, %s3347_s27  ;;  %p3354_p2 = scmp.lt.s32.totalorder %s3352_s3, %s3347_s27 }
  0x4e   : > { %p3350_p10 = pnand %p3349_p9, %p3348_p8  ;;  %p3355_p4 = por %p3354_p2, %p3353_p12 }
  0x50   : > { %p3351_p11 = pneg %p3350_p10 }
  0x52   : > { %p3356_p5 = pnand %p3355_p4, %p3351_p11 }
  0x54   : > { %3359 = shalt.err (!%p3356_p5)
}
  0x55   : > { %3007 = dma.hbm_to_vmem [thread:$0]  (!%p3747_p7), %s633_s23, 128, %s635_s7, %s623_s14  }
  0x56   : > { %s2851_s8 = sshll.u32 %s3491_s21, 4  ;;  %s4055_s19 = sld [smem:[#allocation29_spill]] }
  0x57   : > { %s642_s29 = scalar_lea.sflag [#allocation6], %s641_s9 }
  0x5c   : > { %s650_s26 = scalar_lea.hbm %s4055_s19, %s2851_s8  ;;  %s3382_s7 = scalar_lea.hbm %s4055_s19, 32 }
  0x5d   : > { %s651_s22 = sshll.u32 %s650_s26, 4  ;;  %s652_s22 = int_to_ptr.hbm [resolvable:$true] %s651_s22 }
  0x5e   : > { %s3375_s28 = sshra.s32 %s652_s22, 4  ;;  %s3376_s28 = int_to_ptr.hbm [resolvable:$true] %s3375_s28 }
  0x5f   : > { %s3377_s20 = scalar_lea.hbm %s3376_s28, 16  ;;  %p3383_p11 = scmp.lt.s32.totalorder %s3376_s28, %s4055_s19 }
  0x60   : > { %p3378_p8 = scmp.ne.s32.totalorder %s3376_s28, %s3377_s20  ;;  %p3384_p12 = scmp.lt.s32.totalorder %s3382_s7, %s3377_s20 }
  0x62   : > { %p3380_p5 = pnand %p3378_p8, %p3349_p9  ;;  %p3385_p2 = por %p3384_p12, %p3383_p11 }
  0x64   : > { %p3381_p10 = pneg %p3380_p5 }
  0x66   : > { %p3386_p4 = pnand %p3385_p2, %p3381_p10 }
  0x68   : > { %3389 = shalt.err (!%p3386_p4)
}
  0x69   : > { %s4056_s9 = smov 8   ;;  %s4057_s11 = smov 128  }
  0x6a   : > { %3010 = dma.hbm_to_vmem [thread:$0]  (!%p3747_p7), %s652_s22, 256, %s654_s15, %s642_s29, %s4057_s11, %s4057_s11, %s4056_s9  }
  0x6b   : > { %665 = sbr.rel (%p3639_p3) target bundleno = 3658 (0xe4a), region = 96  ;;  %s3788_s8 = sand.u32 (!%p3639_p3), 1, %s3483_s30  }
  0x6c   : > { %s2437_s13 = sshll.u32 (!%p3639_p3), %s3788_s8, 3  ;;  %s668_s18 = scalar_lea.sflag (!%p3639_p3), [#allocation3], %s3788_s8 }
  0x6d   : > { %s3794_s26 = scalar_lea.vmem (!%p3639_p3), [#allocation2], %s2437_s13 }
  0x70   : > { %3450 = dma.done.wait (%p3724_p13), %s668_s18, 128  }
  0x71   : > { %3452 = vsyncadd (%p3724_p13), %s668_s18, 4294967168  ;;  %s677_s15 = sand.u32 1, %s3634_s24   ;;  %s2438_s25 = sshll.u32 %s3788_s8, 4 }
  0x72   : > { %s678_s29 = scalar_lea.sflag [#allocation6], %s677_s15  ;;  %s3802_s12 = scalar_lea.vmem [#allocation5], %s2438_s25 }
  0x73   : > { %3454 = dma.done.wait (%p3724_p13), %s678_s29, 256  }
  0x74   : > { %3456 = vsyncadd (%p3724_p13), %s678_s29, 4294967040 }
  0x75   : > { %3458 = dma.done.wait (%p62_p1), [#allocation6], 3072  }
  0x76   : > { %3460 = vsyncadd (%p62_p1), [#allocation6], 4294964224 }
  0x77   : > { %3462 = dma.done.wait (%p62_p1), [#allocation9], 2048  }
  0x78   : > { %3464 = vsyncadd (%p62_p1), [#allocation9], 4294965248 }
  0x79   : > { %3466 = dma.done.wait (%p62_p1), [#allocation12], 3072  }
  0x7a   : > { %3468 = vsyncadd (%p62_p1), [#allocation12], 4294964224 }
  0x7b   : > { %3470 = dma.done.wait (%p62_p1), [#allocation15], 4096  }
  0x7c   : > { %3472 = vsyncadd (%p62_p1), [#allocation15], 4294963200  ;;  %v2533_v0 = vld [vmem:[#allocation7 + $0xa8] sm:$0xf]  ;;  %v2874_v1 = vld [vmem:[#allocation7 + $0xb0] sm:$0xf0] }
  0x7d   : > { %v2873_v2 = vld [vmem:[#allocation7 + $0xac] sm:$0xf]  ;;  %v2534_v3 = vor.u32 %v2874_v1, %v2533_v0  ;;  %v2535_v4 = vld [vmem:[#allocation7 + $0xb4] sm:$0xf0]  ;;  %v2521_v5 = vld [vmem:[#allocation7 + $0x90] sm:$0xf] }
  0x7e   : > { %v2871_v6 = vld [vmem:[#allocation7 + $0x98] sm:$0xf0]  ;;  %v2538_v7 = vor.u32 %v2873_v2, %v2535_v4  ;;  %v2870_v8 = vld [vmem:[#allocation7 + $0x94] sm:$0xf]  ;;  %v2523_v9 = vld [vmem:[#allocation7 + $0x9c] sm:$0xf0] }
  0x7f   : > { %942 = vmatpush.bf16.msra.mxu0 %v2534_v3  ;;  %v2522_v10 = vor.u32 %v2871_v6, %v2521_v5  ;;  %v2526_v11 = vor.u32 %v2870_v8, %v2523_v9  ;;  %v2509_v12 = vld [vmem:[#allocation7 + $0x78] sm:$0xf]  ;;  %v2868_v13 = vld [vmem:[#allocation7 + $0x80] sm:$0xf0]  ;;  %v2867_v14 = vld [vmem:[#allocation7 + $0x7c] sm:$0xf] }
  0x80   : > { %955 = vmatpush.bf16.msra.mxu1 %v2538_v7  ;;  %v2511_v15 = vld [vmem:[#allocation7 + $0x84] sm:$0xf0]  ;;  %v2510_v16 = vor.u32 %v2868_v13, %v2509_v12  ;;  %v2497_v18 = vld [vmem:[#allocation7 + $0x60] sm:$0xf]  ;;  %v2865_v19 = vld [vmem:[#allocation7 + $0x68] sm:$0xf0] }
  0x81   : > { %v2514_v17 = vor.u32 %v2867_v14, %v2511_v15  ;;  %v2864_v20 = vld [vmem:[#allocation7 + $0x64] sm:$0xf]  ;;  %v2499_v21 = vld [vmem:[#allocation7 + $0x6c] sm:$0xf0]  ;;  %v2498_v22 = vor.u32 %v2865_v19, %v2497_v18  ;;  %v2875_v24 = vld [vmem:[#allocation7 + $0xb8] sm:$0xf0] }
  0x82   : > { %v2541_v23 = vld [vmem:[#allocation7 + $0xb0] sm:$0xf]  ;;  %v2529_v25 = vld [vmem:[#allocation7 + $0x98] sm:$0xf]  ;;  %v2502_v26 = vor.u32 %v2864_v20, %v2499_v21  ;;  %v2485_v27 = vld [vmem:[#allocation7 + $0x48] sm:$0xf] }
  0x83   : > { %943 = vmatpush.bf16.msra.mxu0 %v2522_v10  ;;  %v2862_v28 = vld [vmem:[#allocation7 + $0x50] sm:$0xf0]  ;;  %v2542_v29 = vor.u32 %v2875_v24, %v2541_v23  ;;  %v2872_v30 = vld [vmem:[#allocation7 + $0xa0] sm:$0xf0]  ;;  %v2861_v31 = vld [vmem:[#allocation7 + $0x4c] sm:$0xf] }
  0x84   : > { %956 = vmatpush.bf16.msra.mxu1 %v2526_v11  ;;  %v2487_v32 = vld [vmem:[#allocation7 + $0x54] sm:$0xf0]  ;;  %v2473_v33 = vld [vmem:[#allocation7 + $0x30] sm:$0xf]  ;;  %v2859_v34 = vld [vmem:[#allocation7 + $0x38] sm:$0xf0]  ;;  %v2530_v35 = vor.u32 %v2872_v30, %v2529_v25  ;;  %v2486_v36 = vor.u32 %v2862_v28, %v2485_v27 }
  0x85   : > { %968 = vmatpush.bf16.msra.mxu2 %v2542_v29  ;;  %v2858_v37 = vld [vmem:[#allocation7 + $0x34] sm:$0xf]  ;;  %v2517_v38 = vld [vmem:[#allocation7 + $0x80] sm:$0xf]  ;;  %v2869_v39 = vld [vmem:[#allocation7 + $0x88] sm:$0xf0]  ;;  %v2490_v40 = vor.u32 %v2861_v31, %v2487_v32  ;;  %v2474_v43 = vor.u32 %v2859_v34, %v2473_v33 }
  0x86   : > { %v2475_v41 = vld [vmem:[#allocation7 + $0x3c] sm:$0xf0]  ;;  %v2518_v42 = vor.u32 %v2869_v39, %v2517_v38  ;;  %v2505_v44 = vld [vmem:[#allocation7 + $0x68] sm:$0xf]  ;;  %v2866_v45 = vld [vmem:[#allocation7 + $0x70] sm:$0xf0] }
  0x87   : > { %944 = vmatpush.bf16.msra.mxu0 %v2510_v16  ;;  %v2478_v46 = vor.u32 %v2858_v37, %v2475_v41  ;;  %v2461_v47 = vld [vmem:[#allocation7 + $0x18] sm:$0xf]  ;;  %v2856_v48 = vld [vmem:[#allocation7 + $0x20] sm:$0xf0]  ;;  %v2855_v49 = vld [vmem:[#allocation7 + $0x1c] sm:$0xf]  ;;  %v2506_v51 = vor.u32 %v2866_v45, %v2505_v44 }
  0x88   : > { %957 = vmatpush.bf16.msra.mxu1 %v2514_v17  ;;  %v2463_v50 = vld [vmem:[#allocation7 + $0x24] sm:$0xf0]  ;;  %v2462_v52 = vor.u32 %v2856_v48, %v2461_v47  ;;  %v2493_v53 = vld [vmem:[#allocation7 + $0x50] sm:$0xf]  ;;  %v2863_v54 = vld [vmem:[#allocation7 + $0x58] sm:$0xf0] }
  0x89   : > { %969 = vmatpush.bf16.msra.mxu2 %v2530_v35  ;;  %v2466_v55 = vor.u32 %v2855_v49, %v2463_v50  ;;  %v2449_v56 = vld [vmem:[#allocation7] sm:$0xf]  ;;  %v2853_v57 = vld [vmem:[#allocation7 + $0x8] sm:$0xf0]  ;;  %v2852_v58 = vld [vmem:[#allocation7 + $0x4] sm:$0xf]  ;;  %v2494_v60 = vor.u32 %v2863_v54, %v2493_v53 }
  0x8a   : > { %v2451_v59 = vld [vmem:[#allocation7 + $0xc] sm:$0xf0]  ;;  %v2450_v61 = vor.u32 %v2853_v57, %v2449_v56  ;;  %v2481_v63 = vld [vmem:[#allocation7 + $0x38] sm:$0xf]  ;;  %v2860_v0 = vld [vmem:[#allocation7 + $0x40] sm:$0xf0] }
  0x8b   : > { %945 = vmatpush.bf16.msra.mxu0 %v2498_v22  ;;  %v3825_v62 = vld [vmem:[%s3794_s26] sm:$0xff]  ;;  %v2454_v1 = vor.u32 %v2852_v58, %v2451_v59  ;;  %v2482_v3 = vor.u32 %v2860_v0, %v2481_v63  ;;  %v2469_v4 = vld [vmem:[#allocation7 + $0x20] sm:$0xf]  ;;  %v2857_v5 = vld [vmem:[#allocation7 + $0x28] sm:$0xf0]  ;;  %vm986_vm0 = vcmask 261120  }
  0x8c   : > { %958 = vmatpush.bf16.msra.mxu1 %v2502_v26  ;;  %v781_v2 = vpack.c.bf16 %v3825_v62, %v3825_v62  ;;  %v2470_v6 = vor.u32 %v2857_v5, %v2469_v4  ;;  %v2457_v7 = vld [vmem:[#allocation7 + $0x8] sm:$0xf]  ;;  %v2854_v8 = vld [vmem:[#allocation7 + $0x10] sm:$0xf0]  ;;  %s3506_s16 = smov 64   ;;  %s3507_s22 = smov 96  }
  0x8d   : > { %970 = vmatpush.bf16.msra.mxu2 %v2518_v42  ;;  %v2458_v9 = vor.u32 %v2854_v8, %v2457_v7  ;;  %s3508_s28 = smov 32   ;;  %vm1022_vm1 = vcmask 1043456   ;;  %vm1006_vm2 = vcmask 64512   ;;  %vm1229_vm3 = vcmask 523264   ;;  %s4058_s15 = sld [smem:[#allocation35_spill]] }
  0x8e   : > { %vm1231_vm4 = vcmask 785408   ;;  %vm1589_vm8 = vcmask 130048   ;;  %s4061_s3 = sld [smem:[#allocation40_spill]]  ;;  %s2848_s7 = sshll.u32 %s3634_s24, 3 }
  0x8f   : > { %946 = vmatpush.bf16.msra.mxu0 %v2486_v36  ;;  %s4062_s9 = sld [smem:[#allocation41_spill]]  ;;  %s2247_s24 = scalar_lea.sflag [#allocation4], %s3788_s8 }
  0x90   : > { %959 = vmatpush.bf16.msra.mxu1 %v2490_v40  ;;  %s4063_s26 = sld [smem:[#allocation43_spill]] }
  0x91   : > { %971 = vmatpush.bf16.msra.mxu2 %v2506_v51 }
  0x93   : > { %947 = vmatpush.bf16.msra.mxu0 %v2474_v43 }
  0x94   : > { %960 = vmatpush.bf16.msra.mxu1 %v2478_v46 }
  0x95   : > { %972 = vmatpush.bf16.msra.mxu2 %v2494_v60 }
  0x96   : > { %s3425_s23 = scalar_lea.hbm %s4063_s26, 16 }
  0x97   : > { %948 = vmatpush.bf16.msra.mxu0 %v2462_v52 }
  0x98   : > { %961 = vmatpush.bf16.msra.mxu1 %v2466_v55 }
  0x99   : > { %973 = vmatpush.bf16.msra.mxu2 %v2482_v3 }
  0x9b   : > { %949 = vmatpush.bf16.msra.mxu0 %v2450_v61 }
  0x9c   : > { %962 = vmatpush.bf16.msra.mxu1 %v2454_v1 }
  0x9d   : > { %974 = vmatpush.bf16.msra.mxu2 %v2470_v6 }
  0x9e   : > { %950 = vmatmul.bf16.vlgmr.msra.gmra.mxu0 %v781_v2 }
  0x9f   : > { %963 = vmatmul.bf16.vlgmr.msra.gmra.mxu1 %v781_v2 }
  0xa1   : > { %975 = vmatpush.bf16.msra.mxu2 %v2458_v9 }
  0xa4   : > { %976 = vmatmul.bf16.vlgmr.msra.gmra.mxu2 %v781_v2 }
 0x11b   : > { %v951_v10 = vpop.f32.mrf.mxu0 }
 0x11c   : > { %v982_v11 = vmul.f32 0.17677669, %v951_v10  ;;  %v964_v12 = vpop.f32.mrf.mxu1 }
 0x11d   : > { %v984_v13 = vpack.c.bf16 %v964_v12, %v964_v12 }
 0x11e   : > { %v983_v14 = vpack.c.bf16 %v982_v11, %v982_v11 }
 0x11f   : > { %v1045_v15 = vunpack.c.l.b16 %v984_v13  ;;  %v991_v16 = vsel %vm986_vm0, %v984_v13, 0 }
 0x120   : > { %1000 = vmatpush.bf16.xpose.msra.mxu3 %v991_v16  ;;  %v1040_v18 = vunpack.c.l.b16 %v983_v14 }
 0x121   : > { %v1046_v17 = vpack.c.b16 %v1045_v15, %v1045_v15 }
 0x122   : > { %v1041_v21 = vpack.c.b16 %v1040_v18, %v1040_v18 }
 0x123   : > { %1106 = vrot.lane.b32.xlu2 %v1046_v17, %s3506_s16  ;;  %1047 = vrot.lane.b32.xlu1 %v1046_v17, %s3507_s22  ;;  %v953_v19 = vpop.f32.mrf.mxu0 }
 0x124   : > { %v966_v20 = vpop.f32.mrf.mxu1 }
 0x127   : > { %2543 = vmatmul.msk.bf16.vlgmr.msra.gmra.mxu3 %vm986_vm0, %v983_v14  ;;  %v977_v22 = vpop.f32.mrf.mxu2 }
 0x128   : > { %v985_v24 = vpack.c.bf16 %v977_v22, %v977_v22 }
 0x12a   : > { %v1024_v25 = vsel %vm1022_vm1, %v985_v24, 0  ;;  %v1081_v58 = vunpack.c.l.b16 %v985_v24 }
 0x12b   : > { %1162 = vrot.lane.b32.xlu2 %v1046_v17, %s3508_s28  ;;  %1042 = vrot.lane.b32.xlu1 %v1041_v21, %s3507_s22 }
 0x12c   : > { %1033 = vmatpush.bf16.msrb.mxu3 %v1024_v25  ;;  %v1082_v59 = vpack.c.b16 %v1081_v58, %v1081_v58  ;;  %v2907_v58 = vld [vmem:[#allocation11 + $0x74] sm:$0xf0] }
 0x12f   : > { %v979_v23 = vpop.f32.mrf.mxu2 }
 0x133   : > { %1160 = vrot.lane.b32.xlu1 %v1041_v21, %s3508_s28 }
 0x17d   : > { %v1107_v26 = vpop.permute.xlu2 %1106 }
 0x17e   : > { %v1112_v27 = vsel %vm986_vm0, %v1107_v26, 0 }
 0x17f   : > { %1121 = vmatpush.bf16.xpose.msrb.mxu2 %v1112_v27 }
 0x185   : > { %v1163_v41 = vpop.permute.xlu2 %1162 }
 0x186   : > { %v1168_v43 = vsel %vm986_vm0, %v1163_v41, 0  ;;  %v2878_v41 = vld [vmem:[#allocation8 + $0x10] sm:$0xff] }
 0x195   : > { %v1048_v28 = vpop.permute.xlu1 %1047 }
 0x196   : > { %v1053_v29 = vsel %vm986_vm0, %v1048_v28, 0 }
 0x197   : > { %1062 = vmatpush.bf16.xpose.msra.mxu3 %v1053_v29 }
 0x19d   : > { %v1043_v45 = vpop.permute.xlu1 %1042 }
 0x1a5   : > { %v1161_v46 = vpop.permute.xlu1 %1160 }
 0x1aa   : > { %v1002_v30 = vpop.f32.mrf.mxu3 }
 0x1ab   : > { %v1007_v31 = vsel %vm1006_vm2, %v1002_v30, -inf }
 0x1ac   : > { %1008 = vmax.xlane.f32.xlu0 %v1007_v31 }
 0x1b2   : > { %v1004_v32 = vpop.f32.mrf.mxu3 }
 0x21f   : > { %v1009_v33 = vpop.xlane.xlu0 %1008 }
 0x220   : > { %v1010_v34 = vsub.f32 %v1002_v30, %v1009_v33 }
 0x222   : > { %v1011_v35 = vmul.f32 1.442695, %v1010_v34 }
 0x224   : > { %3089 = vpow2.f32 %v1011_v35 }
 0x22a   : > { %v3090_v36 = vpop.eup %3089 }
 0x22b   : > { %v1013_v37 = vsel %vm1006_vm2, %v3090_v36, 0.0 }
 0x22c   : > { %1014 = vadd.xlane.f32.xlu0 %v1013_v37  ;;  %v2882_v37 = vld [vmem:[#allocation8 + $0x30] sm:$0xff] }
 0x240   : > { %1104 = vrot.lane.b32.xlu0 %v1041_v21, %s3506_s16 }
 0x29f   : > { %v1015_v38 = vpop.xlane.xlu0 %1014 }
 0x2a0   : > { %3091 = vrcp.f32 %v1015_v38  ;;  %v2881_v38 = vld [vmem:[#allocation8 + $0x28] sm:$0xff] }
 0x2a6   : > { %v3092_v39 = vpop.eup %3091 }
 0x2a7   : > { %v1017_v40 = vmul.f32 %v3092_v39, %v3090_v36  ;;  %v2883_v36 = vld [vmem:[#allocation8 + $0x38] sm:$0xff]  ;;  %v2880_v39 = vld [vmem:[#allocation8 + $0x20] sm:$0xff] }
 0x2a8   : > { %1301 = vmatpush.bf16.msrb.mxu1 %v2883_v36  ;;  %v2885_v36 = vld [vmem:[#allocation10 + $0x8] sm:$0xff] }
 0x2a9   : > { %v1018_v42 = vpack.c.bf16 %v1017_v40, %v1017_v40  ;;  %v2879_v40 = vld [vmem:[#allocation8 + $0x18] sm:$0xff] }
 0x2ab   : > { %2544 = vmatmul.msk.bf16.vlgmr.msrb.gmra.mxu3 %vm1006_vm2, %v1018_v42  ;;  %v2877_v42 = vld [vmem:[#allocation8 + $0x8] sm:$0xff] }
 0x2ac   : > { %1177 = vmatpush.bf16.xpose.msrb.mxu3 %v1168_v43  ;;  %1302 = vmatpush.bf16.msrb.mxu1 %v2882_v37  ;;  %v2876_v43 = vld [vmem:[#allocation8] sm:$0xff] }
 0x2b0   : > { %1303 = vmatpush.bf16.msrb.mxu1 %v2881_v38 }
 0x2b2   : > { %v1105_v44 = vpop.permute.xlu0 %1104 }
 0x2b3   : > { %2547 = vmatmul.msk.bf16.vlgmr.msrb.gmra.mxu2 %vm986_vm0, %v1105_v44 }
 0x2b4   : > { %1304 = vmatpush.bf16.msrb.mxu1 %v2880_v39  ;;  %v2884_v39 = vld [vmem:[#allocation10] sm:$0xff] }
 0x2b8   : > { %1305 = vmatpush.bf16.msrb.mxu1 %v2879_v40 }
 0x2bb   : > { %2545 = vmatmul.msk.bf16.vlgmr.msra.gmra.mxu3 %vm986_vm0, %v1043_v45 }
 0x2bc   : > { %1306 = vmatpush.bf16.msrb.mxu1 %v2878_v41 }
 0x2c0   : > { %1307 = vmatpush.bf16.msrb.mxu1 %v2877_v42 }
 0x2c4   : > { %1308 = vmatpush.bf16.msrb.mxu1 %v2876_v43 }
 0x2cb   : > { %2549 = vmatmul.msk.bf16.vlgmr.msrb.gmra.mxu3 %vm986_vm0, %v1161_v46 }
 0x32e   : > { %v3847_v47 = vpop.f32.mrf.mxu3 }
 0x336   : > { %v1037_v48 = vpop.f32.mrf.mxu3  ;;  %v1123_v49 = vpop.f32.mrf.mxu2 }
 0x337   : > { %v1127_v50 = vsel %vm1006_vm2, %v1123_v49, -inf }
 0x338   : > { %1128 = vmax.xlane.f32.xlu1 %v1127_v50 }
 0x33e   : > { %v1064_v51 = vpop.f32.mrf.mxu3  ;;  %v1125_v52 = vpop.f32.mrf.mxu2 }
 0x33f   : > { %v1068_v53 = vsel %vm1006_vm2, %v1064_v51, -inf  ;;  %v3080_v52 = vld [vmem:[%s3997_s4] ss:$0 sm:$0xff] }
 0x340   : > { %1069 = vmax.xlane.f32.xlu2 %v1068_v53 }
 0x346   : > { %v1066_v54 = vpop.f32.mrf.mxu3 }
 0x34e   : > { %v1179_v55 = vpop.f32.mrf.mxu3 }
 0x34f   : > { %v1183_v56 = vsel %vm1006_vm2, %v1179_v55, -inf }
 0x350   : > { %1184 = vmax.xlane.f32.xlu0 %v1183_v56 }
 0x356   : > { %v1181_v57 = vpop.f32.mrf.mxu3 }
 0x357   : > { %v3509_v57 = vmov 128.0  }
 0x364   : > { %1139 = vrot.lane.b32.xlu0 %v1082_v59, %s3506_s16 }
 0x3ab   : > { %v1129_v60 = vpop.xlane.xlu1 %1128 }
 0x3ac   : > { %v1130_v61 = vsub.f32 %v1123_v49, %v1129_v60 }
 0x3ae   : > { %v1131_v63 = vmul.f32 1.442695, %v1130_v61  ;;  %v2905_v61 = vld [vmem:[#allocation11 + $0x64] sm:$0xf0] }
 0x3b0   : > { %3093 = vpow2.f32 %v1131_v63 }
 0x3b3   : > { %v1070_v0 = vpop.xlane.xlu2 %1069 }
 0x3b4   : > { %v1071_v1 = vsub.f32 %v1064_v51, %v1070_v0 }
 0x3b6   : > { %v3094_v2 = vpop.eup %3093  ;;  %v1072_v3 = vmul.f32 1.442695, %v1071_v1  ;;  %v2657_v1 = vld [vmem:[#allocation11 + $0x50] sm:$0xf] }
 0x3b7   : > { %v1133_v4 = vsel %vm1006_vm2, %v3094_v2, 0.0 }
 0x3b8   : > { %3095 = vpow2.f32 %v1072_v3  ;;  %1134 = vadd.xlane.f32.xlu1 %v1133_v4 }
 0x3be   : > { %v3096_v5 = vpop.eup %3095 }
 0x3bf   : > { %v1074_v6 = vsel %vm1006_vm2, %v3096_v5, 0.0 }
 0x3c0   : > { %1075 = vadd.xlane.f32.xlu2 %v1074_v6  ;;  %v2901_v6 = vld [vmem:[#allocation11 + $0x44] sm:$0xf0] }
 0x3c3   : > { %v1185_v7 = vpop.xlane.xlu0 %1184 }
 0x3c4   : > { %v1186_v8 = vsub.f32 %v1179_v55, %v1185_v7 }
 0x3c6   : > { %v1187_v9 = vmul.f32 1.442695, %v1186_v8  ;;  %v2641_v8 = vld [vmem:[#allocation11 + $0x30] sm:$0xf] }
 0x3c8   : > { %3097 = vpow2.f32 %v1187_v9  ;;  %v2899_v9 = vld [vmem:[#allocation11 + $0x34] sm:$0xf0] }
 0x3ce   : > { %v3098_v10 = vpop.eup %3097 }
 0x3cf   : > { %v1189_v11 = vsel %vm1006_vm2, %v3098_v10, 0.0 }
 0x3d0   : > { %1190 = vadd.xlane.f32.xlu1 %v1189_v11  ;;  %v2642_v11 = vor.u32 %v2899_v9, %v2641_v8 }
 0x3d6   : > { %v1140_v12 = vpop.permute.xlu0 %1139 }
 0x3d7   : > { %v1145_v13 = vsel %vm1022_vm1, %v1140_v12, 0  ;;  %v2633_v12 = vld [vmem:[#allocation11 + $0x20] sm:$0xf] }
 0x3d8   : > { %1083 = vrot.lane.b32.xlu2 %v1082_v59, %s3507_s22  ;;  %1154 = vmatpush.bf16.msra.mxu2 %v1145_v13  ;;  %v2897_v13 = vld [vmem:[#allocation11 + $0x24] sm:$0xf0] }
 0x3e9   : > { %1195 = vrot.lane.b32.xlu1 %v1082_v59, %s3508_s28  ;;  %v2665_v59 = vld [vmem:[#allocation11 + $0x60] sm:$0xf] }
 0x3ea   : > { %v2666_v63 = vor.u32 %v2905_v61, %v2665_v59 }
 0x42b   : > { %v1135_v14 = vpop.xlane.xlu1 %1134 }
 0x42c   : > { %3099 = vrcp.f32 %v1135_v14 }
 0x432   : > { %v3100_v15 = vpop.eup %3099 }
 0x433   : > { %v1137_v16 = vmul.f32 %v3100_v15, %v3094_v2  ;;  %v1076_v17 = vpop.xlane.xlu2 %1075  ;;  %v2903_v2 = vld [vmem:[#allocation11 + $0x54] sm:$0xf0]  ;;  %v2634_v15 = vor.u32 %v2897_v13, %v2633_v12  ;;  %v2906_v12 = vld [vmem:[#allocation11 + $0x74] sm:$0xf]  ;;  %v2675_v13 = vld [vmem:[#allocation11 + $0x78] sm:$0xf0] }
 0x434   : > { %3101 = vrcp.f32 %v1076_v17  ;;  %v2658_v4 = vor.u32 %v2903_v2, %v2657_v1  ;;  %v2895_v17 = vld [vmem:[#allocation11 + $0x14] sm:$0xf0] }
 0x435   : > { %v1138_v18 = vpack.c.bf16 %v1137_v16, %v1137_v16  ;;  %v2625_v16 = vld [vmem:[#allocation11 + $0x10] sm:$0xf] }
 0x437   : > { %2548 = vmatmul.msk.bf16.vlgmr.msra.gmra.mxu2 %vm1006_vm2, %v1138_v18 }
 0x43a   : > { %v3102_v19 = vpop.eup %3101 }
 0x43b   : > { %v1078_v20 = vmul.f32 %v3102_v19, %v3096_v5  ;;  %v1084_v21 = vpop.permute.xlu2 %1083  ;;  %v2649_v5 = vld [vmem:[#allocation11 + $0x40] sm:$0xf]  ;;  %v2626_v19 = vor.u32 %v2895_v17, %v2625_v16  ;;  %v2667_v16 = vld [vmem:[#allocation11 + $0x68] sm:$0xf0] }
 0x43c   : > { %v1089_v22 = vsel %vm1022_vm1, %v1084_v21, 0  ;;  %v2650_v7 = vor.u32 %v2901_v6, %v2649_v5  ;;  %v2893_v21 = vld [vmem:[#allocation11 + $0x4] sm:$0xf0] }
 0x43d   : > { %1098 = vmatpush.bf16.msrb.mxu0 %v1089_v22  ;;  %v1079_v23 = vpack.c.bf16 %v1078_v20, %v1078_v20  ;;  %v2617_v20 = vld [vmem:[#allocation11] sm:$0xf] }
 0x440   : > { %2546 = vmatmul.msk.bf16.vlgmr.msrb.gmra.mxu0 %vm1006_vm2, %v1079_v23 }
 0x443   : > { %v1191_v24 = vpop.xlane.xlu1 %1190 }
 0x444   : > { %3103 = vrcp.f32 %v1191_v24  ;;  %v2618_v24 = vor.u32 %v2893_v21, %v2617_v20  ;;  %v2659_v20 = vld [vmem:[#allocation11 + $0x58] sm:$0xf0] }
 0x445   : > { %3105 = vrcp.f32 %v3509_v57 }
 0x44a   : > { %v3104_v25 = vpop.eup %3103 }
 0x44b   : > { %v1193_v26 = vmul.f32 %v3104_v25, %v3098_v10  ;;  %v3106_v0 = vpop.eup %3105 }
 0x44c   : > { %v1320_v3 = vmul.f32 128.0, %v3106_v0  ;;  %vm1324_vm5 = vweird.f32 %v3106_v0 }
 0x44d   : > { %v1194_v29 = vpack.c.bf16 %v1193_v26, %v1193_v26 }
 0x45b   : > { %v1196_v27 = vpop.permute.xlu1 %1195 }
 0x45c   : > { %v1201_v28 = vsel %vm1022_vm1, %v1196_v27, 0  ;;  %v779_v27 = vld [vmem:[%s3802_s12] sm:$0xff] }
 0x45d   : > { %1210 = vmatpush.bf16.msra.mxu0 %v1201_v28  ;;  %v780_v28 = vld [vmem:[%s3802_s12 + $0x8] sm:$0xff]  ;;  %s4059_s12 = sld [smem:[#allocation36_spill]] }
 0x460   : > { %2550 = vmatmul.msk.bf16.vlgmr.msra.gmra.mxu0 %vm1006_vm2, %v1194_v29  ;;  %v3880_v29 = vpack.c.bf16 %v780_v28, %v779_v27 }
 0x4ba   : > { %v1156_v30 = vpop.f32.mrf.mxu2 }
 0x4bd   : > { %v1100_v31 = vpop.f32.mrf.mxu0 }
 0x4be   : > { %1217 = vrot.lane.b32.xlu2 %v1100_v31, %s3508_s28  ;;  %v2890_v31 = vld [vmem:[#allocation10 + $0x30] sm:$0xff] }
 0x4c2   : > { %v1158_v32 = vpop.f32.mrf.mxu2 }
 0x4c3   : > { %v2889_v32 = vld [vmem:[#allocation10 + $0x28] sm:$0xff] }
 0x4c5   : > { %v1102_v33 = vpop.f32.mrf.mxu0 }
 0x4c6   : > { %1221 = vrot.lane.b32.xlu2 %v1156_v30, %s3506_s16  ;;  %v2891_v30 = vld [vmem:[#allocation10 + $0x38] sm:$0xff]  ;;  %v2888_v33 = vld [vmem:[#allocation10 + $0x20] sm:$0xff] }
 0x4c7   : > { %1420 = vmatpush.bf16.msrb.mxu2 %v2891_v30  ;;  %v2896_v30 = vld [vmem:[#allocation11 + $0x24] sm:$0xf] }
 0x4cb   : > { %1421 = vmatpush.bf16.msrb.mxu2 %v2890_v31  ;;  %v2635_v31 = vld [vmem:[#allocation11 + $0x28] sm:$0xf0] }
 0x4cf   : > { %1422 = vmatpush.bf16.msrb.mxu2 %v2889_v32  ;;  %v2638_v32 = vor.u32 %v2896_v30, %v2635_v31 }
 0x4d3   : > { %1423 = vmatpush.bf16.msrb.mxu2 %v2888_v33  ;;  %v2894_v33 = vld [vmem:[#allocation11 + $0x14] sm:$0xf] }
 0x4dd   : > { %v1212_v34 = vpop.f32.mrf.mxu0 }
 0x4de   : > { %1225 = vrot.lane.b32.xlu0 %v1212_v34, %s3507_s22  ;;  %v2887_v34 = vld [vmem:[#allocation10 + $0x18] sm:$0xff] }
 0x4df   : > { %1424 = vmatpush.bf16.msrb.mxu2 %v2887_v34  ;;  %v2627_v34 = vld [vmem:[#allocation11 + $0x18] sm:$0xf0] }
 0x4e5   : > { %v1214_v35 = vpop.f32.mrf.mxu0 }
 0x4e6   : > { %v2886_v35 = vld [vmem:[#allocation10 + $0x10] sm:$0xff] }
 0x4e7   : > { %1425 = vmatpush.bf16.msrb.mxu2 %v2886_v35 }
 0x4eb   : > { %1426 = vmatpush.bf16.msrb.mxu2 %v2885_v36 }
 0x4ef   : > { %1427 = vmatpush.bf16.msrb.mxu2 %v2884_v39 }
 0x518   : > { %v1218_v44 = vpop.permute.xlu2 %1217 }
 0x519   : > { %v1228_v46 = vsel %vm986_vm0, %v3847_v47, %v1218_v44  ;;  %v2673_v47 = vld [vmem:[#allocation11 + $0x70] sm:$0xf] }
 0x51a   : > { %v2674_v60 = vor.u32 %v2907_v58, %v2673_v47 }
 0x51c   : > { %1530 = vmatpush.bf16.msra.mxu3 %v2674_v60 }
 0x520   : > { %v1222_v45 = vpop.permute.xlu2 %1221  ;;  %1531 = vmatpush.bf16.msra.mxu3 %v2666_v63 }
 0x521   : > { %v1230_v48 = vsel %vm1229_vm3, %v1228_v46, %v1222_v45 }
 0x524   : > { %1532 = vmatpush.bf16.msra.mxu3 %v2658_v4 }
 0x528   : > { %1533 = vmatpush.bf16.msra.mxu3 %v2650_v7 }
 0x52c   : > { %1534 = vmatpush.bf16.msra.mxu3 %v2642_v11 }
 0x530   : > { %1535 = vmatpush.bf16.msra.mxu3 %v2634_v15  ;;  %v2678_v15 = vor.u32 %v2906_v12, %v2675_v13 }
 0x532   : > { %1544 = vmatpush.bf16.msrb.mxu0 %v2678_v15 }
 0x534   : > { %1536 = vmatpush.bf16.msra.mxu3 %v2626_v19  ;;  %v2902_v19 = vld [vmem:[#allocation11 + $0x54] sm:$0xf] }
 0x535   : > { %v2662_v21 = vor.u32 %v2902_v19, %v2659_v20 }
 0x538   : > { %1537 = vmatpush.bf16.msra.mxu3 %v2618_v24 }
 0x53b   : > { %1538 = vmatmul.bf16.vlgmr.msra.gmra.mxu3 %v3880_v29 }
 0x550   : > { %v1226_v49 = vpop.permute.xlu0 %1225 }
 0x551   : > { %v1232_v50 = vsel %vm1231_vm4, %v1230_v48, %v1226_v49 }
 0x552   : > { %v1233_v51 = vpack.c.bf16 %v1232_v50, %v1232_v50 }
 0x554   : > { %1309 = vmatmul.bf16.vlgmr.msrb.gmra.mxu1 %v1233_v51 }
 0x5be   : > { %v1539_v58 = vpop.f32.mrf.mxu3 }
 0x5bf   : > { %v1561_v59 = vpack.c.bf16 %v1539_v58, %v1539_v58 }
 0x5c1   : > { %v1567_v61 = vunpack.c.l.b16 %v1561_v59 }
 0x5c6   : > { %v1541_v60 = vpop.f32.mrf.mxu3 }
 0x5c7   : > { %v1562_v63 = vpack.c.bf16 %v1541_v60, %v1541_v60 }
 0x5d1   : > { %v1310_v53 = vpop.f32.mrf.mxu1 }
 0x5d2   : > { %v1311_v54 = vadd.f32 %v3080_v52, %v1310_v53  ;;  %v3081_v52 = vld [vmem:[%s3998_s5] ss:$0 sm:$0xff] }
 0x5d4   : > { %v1314_v55 = vadd.f32 %v1311_v54, %v3825_v62  ;;  %v1321_v62 = vsub.f32 1.0, %v1320_v3 }
 0x5d6   : > { %1317 = vadd.xlane.f32.xlu2 %v1314_v55  ;;  %v1322_v10 = vmul.f32 %v3106_v0, %v1321_v62 }
 0x5d8   : > { %v1323_v14 = vadd.f32 %v3106_v0, %v1322_v10 }
 0x5d9   : > { %v1312_v56 = vpop.f32.mrf.mxu1 }
 0x5da   : > { %v3875_v18 = vsel %vm1324_vm5, %v3106_v0, %v1323_v14  ;;  %v1568_v0 = vunpack.c.l.b16 %v1562_v63  ;;  %v2904_v14 = vld [vmem:[#allocation11 + $0x64] sm:$0xf] }
 0x5db   : > { %v2670_v17 = vor.u32 %v2904_v14, %v2667_v16 }
 0x5dc   : > { %v1569_v1 = vpack.c.b16 %v1568_v0, %v1567_v61 }
 0x5dd   : > { %1545 = vmatpush.bf16.msrb.mxu0 %v2670_v17 }
 0x5de   : > { %1629 = vrot.lane.b32.xlu1 %v1569_v1, %s3507_s22  ;;  %v1574_v2 = vsel %vm986_vm0, %v1569_v1, 0 }
 0x5df   : > { %1583 = vmatpush.bf16.xpose.msra.mxu1 %v1574_v2 }
 0x5e1   : > { %1546 = vmatpush.bf16.msrb.mxu0 %v2662_v21 }
 0x5e6   : > { %1683 = vrot.lane.b32.xlu1 %v1569_v1, %s3506_s16 }
 0x649   : > { %v1318_v22 = vpop.xlane.xlu2 %1317 }
 0x64a   : > { %v1326_v23 = vmul.f32 %v3875_v18, %v1318_v22  ;;  %v2900_v22 = vld [vmem:[#allocation11 + $0x44] sm:$0xf] }
 0x64c   : > { %v1327_v25 = vsub.f32 %v1314_v55, %v1326_v23  ;;  %v3082_v55 = vld [vmem:[%s3999_s6] ss:$0 sm:$0xff]  ;;  %v2651_v23 = vld [vmem:[#allocation11 + $0x48] sm:$0xf0] }
 0x64d   : > { %v2654_v24 = vor.u32 %v2900_v22, %v2651_v23 }
 0x64e   : > { %v1328_v26 = vmul.f32 %v1327_v25, %v1327_v25 }
 0x64f   : > { %1547 = vmatpush.bf16.msrb.mxu0 %v2654_v24 }
 0x650   : > { %1329 = vadd.xlane.f32.xlu0 %v1328_v26  ;;  %v1630_v8 = vpop.permute.xlu1 %1629  ;;  %v2643_v26 = vld [vmem:[#allocation11 + $0x38] sm:$0xf0] }
 0x651   : > { %v1635_v9 = vsel %vm986_vm0, %v1630_v8, 0 }
 0x652   : > { %1644 = vmatpush.bf16.xpose.msrb.mxu3 %v1635_v9 }
 0x658   : > { %v1684_v10 = vpop.permute.xlu1 %1683 }
 0x659   : > { %v1689_v11 = vsel %vm986_vm0, %v1684_v10, 0 }
 0x65a   : > { %1698 = vmatpush.bf16.xpose.msrb.mxu1 %v1689_v11 }
 0x6c3   : > { %v1330_v37 = vpop.xlane.xlu0 %1329 }
 0x6c4   : > { %v1331_v38 = vmul.f32 0.007874016, %v1330_v37 }
 0x6c6   : > { %3107 = vrsqrt.f32 %v1331_v38  ;;  %vm1339_vm6 = vcmp.eq.f32.partialorder %v1331_v38, inf  ;;  %v1342_v48 = vand.u32 2147483648, %v1331_v38  ;;  %vm1341_vm7 = vcmp.eq.f32.partialorder %v1331_v38, 0.0 }
 0x6cc   : > { %v3108_v40 = vpop.eup %3107 }
 0x6cd   : > { %v1333_v41 = vmul.f32 %v3108_v40, %v1331_v38 }
 0x6cf   : > { %v1334_v42 = vmul.f32 %v3108_v40, %v1333_v41  ;;  %v2619_v41 = vld [vmem:[#allocation11 + $0x8] sm:$0xf0] }
 0x6d1   : > { %v1335_v43 = vmul.f32 0.5, %v1334_v42 }
 0x6d3   : > { %v1336_v44 = vsub.f32 1.5, %v1335_v43 }
 0x6d5   : > { %v1337_v45 = vmul.f32 %v3108_v40, %v1336_v44  ;;  %v2892_v40 = vld [vmem:[#allocation11 + $0x4] sm:$0xf] }
 0x6d6   : > { %v2622_v42 = vor.u32 %v2892_v40, %v2619_v41 }
 0x6d7   : > { %v1338_v46 = vmul.f32 %v1337_v45, %v1331_v38 }
 0x6d9   : > { %v1340_v49 = vsel %vm1339_vm6, %v1331_v38, %v1338_v46  ;;  %v2630_v38 = vor.u32 %v2894_v33, %v2627_v34 }
 0x6da   : > { %v1343_v50 = vsel %vm1341_vm7, %v1342_v48, %v1340_v49 }
 0x6db   : > { %v1344_v51 = vadd.f32 1e-10, %v1343_v50 }
 0x6dd   : > { %3109 = vrcp.f32 %v1344_v51 }
 0x6e3   : > { %v3110_v53 = vpop.eup %3109 }
 0x6e4   : > { %v1346_v54 = vmul.f32 %v3110_v53, %v1327_v25  ;;  %v2898_v25 = vld [vmem:[#allocation11 + $0x34] sm:$0xf] }
 0x6e5   : > { %v2646_v28 = vor.u32 %v2898_v25, %v2643_v26 }
 0x6e6   : > { %v1350_v56 = vmul.f32 %v3081_v52, %v1346_v54 }
 0x6e7   : > { %1548 = vmatpush.bf16.msrb.mxu0 %v2646_v28 }
 0x6e8   : > { %v3889_v57 = vadd.f32 %v3082_v55, %v1350_v56 }
 0x6ea   : > { %v1355_v47 = vpack.c.bf16 %v3889_v57, %v3889_v57 }
 0x6eb   : > { %1549 = vmatpush.bf16.msrb.mxu0 %v2638_v32 }
 0x6ec   : > { %1428 = vmatmul.bf16.vlgmr.msrb.gmra.mxu2 %v1355_v47 }
 0x6ef   : > { %1550 = vmatpush.bf16.msrb.mxu0 %v2630_v38 }
 0x6f3   : > { %1551 = vmatpush.bf16.msrb.mxu0 %v2622_v42 }
 0x6f6   : > { %1552 = vmatmul.bf16.vlgmr.msrb.gmra.mxu0 %v3880_v29 }
 0x76f   : > { %v1429_v3 = vpop.f32.mrf.mxu2 }
 0x770   : > { %v1559_v4 = vmul.f32 0.17677669, %v1429_v3 }
 0x772   : > { %v1560_v5 = vpack.c.bf16 %v1559_v4, %v1559_v4 }
 0x773   : > { %v1553_v56 = vpop.f32.mrf.mxu0 }
 0x774   : > { %v1625_v6 = vunpack.c.l.b16 %v1560_v5  ;;  %2679 = vmatmul.msk.bf16.vlgmr.msra.gmra.mxu1 %vm986_vm0, %v1560_v5  ;;  %v1563_v58 = vpack.c.bf16 %v1553_v56, %v1553_v56 }
 0x776   : > { %v1626_v62 = vpack.c.b16 %v1625_v6, %v1625_v6  ;;  %v1604_v61 = vunpack.c.l.b16 %v1563_v58 }
 0x777   : > { %v1431_v7 = vpop.f32.mrf.mxu2 }
 0x778   : > { %1735 = vrot.lane.b32.xlu2 %v1626_v62, %s3508_s28  ;;  %1627 = vrot.lane.b32.xlu1 %v1626_v62, %s3507_s22 }
 0x77b   : > { %v1555_v60 = vpop.f32.mrf.mxu0 }
 0x77c   : > { %v1564_v63 = vpack.c.bf16 %v1555_v60, %v1555_v60 }
 0x77e   : > { %v1605_v0 = vunpack.c.l.b16 %v1564_v63  ;;  %v3083_v63 = vld [vmem:[%s4003_s10] ss:$0 sm:$0xff] }
 0x780   : > { %1737 = vrot.lane.b32.xlu1 %v1569_v1, %s3508_s28  ;;  %v1606_v2 = vpack.c.b16 %v1605_v0, %v1604_v61 }
 0x782   : > { %1618 = vmatpush.bf16.msra.mxu2 %v1606_v2 }
 0x788   : > { %1681 = vrot.lane.b32.xlu1 %v1626_v62, %s3506_s16 }
 0x7d2   : > { %v1736_v44 = vpop.permute.xlu2 %1735 }
 0x7ea   : > { %v1628_v27 = vpop.permute.xlu1 %1627 }
 0x7eb   : > { %2681 = vmatmul.msk.bf16.vlgmr.msrb.gmra.mxu3 %vm986_vm0, %v1628_v27 }
 0x7f1   : > { %v1585_v35 = vpop.f32.mrf.mxu1 }
 0x7f2   : > { %v1738_v36 = vpop.permute.xlu1 %1737  ;;  %v1590_v37 = vsel %vm1589_vm8, %v1585_v35, -inf }
 0x7f3   : > { %v1743_v39 = vsel %vm986_vm0, %v1738_v36, 0  ;;  %1591 = vmax.xlane.f32.xlu1 %v1590_v37 }
 0x7f4   : > { %1752 = vmatpush.bf16.xpose.msra.mxu3 %v1743_v39 }
 0x7f9   : > { %v1587_v43 = vpop.f32.mrf.mxu1 }
 0x7fa   : > { %v1682_v45 = vpop.permute.xlu1 %1681 }
 0x7fb   : > { %2683 = vmatmul.msk.bf16.vlgmr.msrb.gmra.mxu1 %vm986_vm0, %v1682_v45  ;;  %2685 = vmatmul.msk.bf16.vlgmr.msra.gmra.mxu3 %vm986_vm0, %v1736_v44 }
 0x866   : > { %v1592_v46 = vpop.xlane.xlu1 %1591 }
 0x867   : > { %v1593_v48 = vsub.f32 %v1585_v35, %v1592_v46 }
 0x869   : > { %v1594_v49 = vmul.f32 1.442695, %v1593_v48  ;;  %v2915_v48 = vld [vmem:[#allocation13 + $0x38] sm:$0xff] }
 0x86a   : > { %1872 = vmatpush.bf16.msra.mxu1 %v2915_v48  ;;  %v2731_v48 = vld [vmem:[#allocation14 + $0x18] sm:$0xf0] }
 0x86b   : > { %3111 = vpow2.f32 %v1594_v49  ;;  %v2914_v49 = vld [vmem:[#allocation13 + $0x30] sm:$0xff] }
 0x86e   : > { %v1646_v50 = vpop.f32.mrf.mxu3  ;;  %1873 = vmatpush.bf16.msra.mxu1 %v2914_v49 }
 0x86f   : > { %v1650_v29 = vsel %vm1589_vm8, %v1646_v50, -inf }
 0x871   : > { %v3112_v51 = vpop.eup %3111 }
 0x872   : > { %v1596_v52 = vsel %vm1589_vm8, %v3112_v51, 0.0 }
 0x873   : > { %1597 = vadd.xlane.f32.xlu2 %v1596_v52  ;;  %v2911_v52 = vld [vmem:[#allocation13 + $0x18] sm:$0xff] }
 0x876   : > { %v1648_v53 = vpop.f32.mrf.mxu3 }
 0x877   : > { %v2910_v53 = vld [vmem:[#allocation13 + $0x10] sm:$0xff] }
 0x878   : > { %v1700_v54 = vpop.f32.mrf.mxu1 }
 0x879   : > { %v1704_v55 = vsel %vm1589_vm8, %v1700_v54, -inf }
 0x87a   : > { %1705 = vmax.xlane.f32.xlu0 %v1704_v55  ;;  %v2908_v55 = vld [vmem:[#allocation13] sm:$0xff] }
 0x87e   : > { %v1754_v47 = vpop.f32.mrf.mxu3 }
 0x87f   : > { %v1758_v3 = vsel %vm1589_vm8, %v1754_v47, -inf }
 0x880   : > { %v1702_v59 = vpop.f32.mrf.mxu1 }
 0x882   : > { %1651 = vmax.xlane.f32.xlu0 %v1650_v29 }
 0x886   : > { %v1756_v1 = vpop.f32.mrf.mxu3 }
 0x88a   : > { %1759 = vmax.xlane.f32.xlu0 %v1758_v3 }
 0x89e   : > { %1662 = vrot.lane.b32.xlu0 %v1606_v2, %s3507_s22 }
 0x8e6   : > { %v1598_v4 = vpop.xlane.xlu2 %1597 }
 0x8e7   : > { %3113 = vrcp.f32 %v1598_v4 }
 0x8ed   : > { %v3114_v5 = vpop.eup %3113  ;;  %v1706_v6 = vpop.xlane.xlu0 %1705 }
 0x8ee   : > { %v1600_v62 = vmul.f32 %v3114_v5, %v3112_v51  ;;  %v1707_v7 = vsub.f32 %v1700_v54, %v1706_v6  ;;  %v2912_v51 = vld [vmem:[#allocation13 + $0x20] sm:$0xff]  ;;  %v2909_v54 = vld [vmem:[#allocation13 + $0x8] sm:$0xff] }
 0x8f0   : > { %v1601_v8 = vpack.c.bf16 %v1600_v62, %v1600_v62  ;;  %v1708_v9 = vmul.f32 1.442695, %v1707_v7  ;;  %v2777_v7 = vld [vmem:[#allocation14 + $0x70] sm:$0xf] }
 0x8f2   : > { %3115 = vpow2.f32 %v1708_v9  ;;  %2680 = vmatmul.msk.bf16.vlgmr.msra.gmra.mxu2 %vm1589_vm8, %v1601_v8  ;;  %v2931_v8 = vld [vmem:[#allocation14 + $0x74] sm:$0xf0]  ;;  %v2930_v9 = vld [vmem:[#allocation14 + $0x74] sm:$0xf] }
 0x8f5   : > { %v1652_v10 = vpop.xlane.xlu0 %1651 }
 0x8f6   : > { %v1653_v11 = vsub.f32 %v1646_v50, %v1652_v10  ;;  %v2913_v50 = vld [vmem:[#allocation13 + $0x28] sm:$0xff]  ;;  %v2778_v10 = vor.u32 %v2931_v8, %v2777_v7  ;;  %v2936_v7 = vld [vmem:[#allocation16 + $0x20] sm:$0xff] }
 0x8f7   : > { %1874 = vmatpush.bf16.msra.mxu1 %v2913_v50  ;;  %v2944_v8 = vld [vmem:[#allocation16 + $0x60] sm:$0xff] }
 0x8f8   : > { %v3116_v12 = vpop.eup %3115  ;;  %v1654_v13 = vmul.f32 1.442695, %v1653_v11  ;;  %v2779_v11 = vld [vmem:[#allocation14 + $0x78] sm:$0xf0] }
 0x8f9   : > { %v1710_v14 = vsel %vm1589_vm8, %v3116_v12, 0.0 }
 0x8fa   : > { %3117 = vpow2.f32 %v1654_v13  ;;  %1711 = vadd.xlane.f32.xlu1 %v1710_v14  ;;  %v2929_v13 = vld [vmem:[#allocation14 + $0x64] sm:$0xf0]  ;;  %v2928_v14 = vld [vmem:[#allocation14 + $0x64] sm:$0xf] }
 0x8fb   : > { %1875 = vmatpush.bf16.msra.mxu1 %v2912_v51 }
 0x8fd   : > { %v1760_v15 = vpop.xlane.xlu0 %1759 }
 0x8fe   : > { %v1761_v16 = vsub.f32 %v1754_v47, %v1760_v15 }
 0x8ff   : > { %1876 = vmatpush.bf16.msra.mxu1 %v2911_v52  ;;  %v2721_v52 = vld [vmem:[#allocation14] sm:$0xf] }
 0x900   : > { %v3118_v17 = vpop.eup %3117  ;;  %v1762_v19 = vmul.f32 1.442695, %v1761_v16  ;;  %v2771_v16 = vld [vmem:[#allocation14 + $0x68] sm:$0xf0] }
 0x901   : > { %v1656_v20 = vsel %vm1589_vm8, %v3118_v17, 0.0 }
 0x902   : > { %3119 = vpow2.f32 %v1762_v19  ;;  %1657 = vadd.xlane.f32.xlu0 %v1656_v20  ;;  %v2761_v19 = vld [vmem:[#allocation14 + $0x50] sm:$0xf]  ;;  %v2927_v20 = vld [vmem:[#allocation14 + $0x54] sm:$0xf0] }
 0x903   : > { %1877 = vmatpush.bf16.msra.mxu1 %v2910_v53  ;;  %v2917_v53 = vld [vmem:[#allocation14 + $0x4] sm:$0xf0] }
 0x907   : > { %1878 = vmatpush.bf16.msra.mxu1 %v2909_v54 }
 0x908   : > { %v3120_v21 = vpop.eup %3119 }
 0x909   : > { %v1764_v22 = vsel %vm1589_vm8, %v3120_v21, 0.0 }
 0x90a   : > { %1765 = vadd.xlane.f32.xlu1 %v1764_v22  ;;  %v2762_v22 = vor.u32 %v2927_v20, %v2761_v19 }
 0x90b   : > { %1879 = vmatpush.bf16.msra.mxu1 %v2908_v55  ;;  %v2916_v55 = vld [vmem:[#allocation14 + $0x4] sm:$0xf] }
 0x910   : > { %v1663_v23 = vpop.permute.xlu0 %1662 }
 0x911   : > { %1675 = vmatpush.bf16.msra.mxu0 %v1663_v23  ;;  %v2763_v23 = vld [vmem:[#allocation14 + $0x58] sm:$0xf0] }
 0x916   : > { %1716 = vrot.lane.b32.xlu0 %v1606_v2, %s3506_s16 }
 0x923   : > { %1770 = vrot.lane.b32.xlu1 %v1606_v2, %s3508_s28 }
 0x96d   : > { %v1712_v26 = vpop.xlane.xlu1 %1711 }
 0x975   : > { %v1658_v24 = vpop.xlane.xlu0 %1657  ;;  %v1620_v25 = vpop.f32.mrf.mxu2 }
 0x976   : > { %3121 = vrcp.f32 %v1658_v24 }
 0x977   : > { %3123 = vrcp.f32 %v1712_v26  ;;  %v2925_v26 = vld [vmem:[#allocation14 + $0x44] sm:$0xf0] }
 0x97c   : > { %v3122_v27 = vpop.eup %3121 }
 0x97d   : > { %v1660_v28 = vmul.f32 %v3122_v27, %v3118_v17  ;;  %v1622_v30 = vpop.f32.mrf.mxu2  ;;  %v3124_v32 = vpop.eup %3123  ;;  %v2774_v17 = vor.u32 %v2928_v14, %v2771_v16  ;;  %v2924_v27 = vld [vmem:[#allocation14 + $0x44] sm:$0xf]  ;;  %v2942_v16 = vld [vmem:[#allocation16 + $0x50] sm:$0xff] }
 0x97e   : > { %v1714_v33 = vmul.f32 %v3124_v32, %v3116_v12  ;;  %v1766_v34 = vpop.xlane.xlu1 %1765  ;;  %v2782_v12 = vor.u32 %v2930_v9, %v2779_v11  ;;  %v2755_v30 = vld [vmem:[#allocation14 + $0x48] sm:$0xf0]  ;;  %v2923_v32 = vld [vmem:[#allocation14 + $0x34] sm:$0xf0] }
 0x97f   : > { %v1661_v31 = vpack.c.bf16 %v1660_v28, %v1660_v28  ;;  %3125 = vrcp.f32 %v1766_v34  ;;  %v2922_v34 = vld [vmem:[#allocation14 + $0x34] sm:$0xf] }
 0x980   : > { %v1715_v36 = vpack.c.bf16 %v1714_v33, %v1714_v33  ;;  %2067 = vmatpush.bf16.msrb.mxu3 %v2782_v12  ;;  %v2758_v33 = vor.u32 %v2924_v27, %v2755_v30  ;;  %v2932_v27 = vld [vmem:[#allocation16] sm:$0xff] }
 0x981   : > { %2682 = vmatmul.msk.bf16.vlgmr.msra.gmra.mxu0 %vm1589_vm8, %v1661_v31  ;;  %v2745_v31 = vld [vmem:[#allocation14 + $0x30] sm:$0xf] }
 0x984   : > { %2068 = vmatpush.bf16.msrb.mxu3 %v2774_v17  ;;  %v3084_v17 = vld [vmem:[%s4058_s15] ss:$0 sm:$0xff]  ;;  %s2257_s15 = scalar_lea.hbm %s4063_s26, %s2848_s7 }
 0x985   : > { %v3126_v37 = vpop.eup %3125 }
 0x986   : > { %v1768_v38 = vmul.f32 %v3126_v37, %v3120_v21  ;;  %v2926_v21 = vld [vmem:[#allocation14 + $0x54] sm:$0xf] }
 0x987   : > { %v2766_v24 = vor.u32 %v2926_v21, %v2763_v23  ;;  %v3085_v21 = vld [vmem:[%s4059_s12] ss:$0 sm:$0xff]  ;;  %s4064_s12 = sld [smem:[#allocation42_spill]] }
 0x988   : > { %v1717_v35 = vpop.permute.xlu0 %1716  ;;  %v1769_v40 = vpack.c.bf16 %v1768_v38, %v1768_v38  ;;  %v2737_v38 = vld [vmem:[#allocation14 + $0x20] sm:$0xf] }
 0x989   : > { %1729 = vmatpush.bf16.msrb.mxu2 %v1717_v35  ;;  %2069 = vmatpush.bf16.msrb.mxu3 %v2766_v24  ;;  %v2747_v35 = vld [vmem:[#allocation14 + $0x38] sm:$0xf0] }
 0x98a   : > { %v2750_v37 = vor.u32 %v2922_v34, %v2747_v35 }
 0x98c   : > { %2684 = vmatmul.msk.bf16.vlgmr.msrb.gmra.mxu2 %vm1589_vm8, %v1715_v36  ;;  %v2746_v36 = vor.u32 %v2923_v32, %v2745_v31 }
 0x98d   : > { %2054 = vmatpush.bf16.msra.mxu2 %v2778_v10  ;;  %2070 = vmatpush.bf16.msrb.mxu3 %v2758_v33 }
 0x991   : > { %2071 = vmatpush.bf16.msrb.mxu3 %v2750_v37 }
 0x995   : > { %v1771_v39 = vpop.permute.xlu1 %1770 }
 0x996   : > { %1783 = vmatpush.bf16.msrb.mxu0 %v1771_v39  ;;  %v2921_v39 = vld [vmem:[#allocation14 + $0x24] sm:$0xf0] }
 0x999   : > { %2686 = vmatmul.msk.bf16.vlgmr.msrb.gmra.mxu0 %vm1589_vm8, %v1769_v40  ;;  %v2920_v40 = vld [vmem:[#allocation14 + $0x24] sm:$0xf] }
 0x9fe   : > { %v1677_v41 = vpop.f32.mrf.mxu0 }
 0x9ff   : > { %1790 = vrot.lane.b32.xlu0 %v1677_v41, %s3508_s28  ;;  %v2739_v41 = vld [vmem:[#allocation14 + $0x28] sm:$0xf0]  ;;  %s4060_s28 = sld [smem:[#allocation38_spill]] }
 0xa06   : > { %v1679_v42 = vpop.f32.mrf.mxu0 }
 0xa07   : > { %v2738_v42 = vor.u32 %v2921_v39, %v2737_v38 }
 0xa0f   : > { %v1731_v43 = vpop.f32.mrf.mxu2 }
 0xa10   : > { %1794 = vrot.lane.b32.xlu2 %v1731_v43, %s3506_s16  ;;  %v2742_v43 = vor.u32 %v2920_v40, %v2739_v41  ;;  %s776_s16 = scalar_lea.vmem [#allocation17], %s2437_s13 }
 0xa12   : > { %2072 = vmatpush.bf16.msrb.mxu3 %v2742_v43 }
 0xa16   : > { %v1785_v44 = vpop.f32.mrf.mxu0 }
 0xa17   : > { %1798 = vrot.lane.b32.xlu0 %v1785_v44, %s3507_s22  ;;  %v1733_v45 = vpop.f32.mrf.mxu2  ;;  %v2729_v44 = vld [vmem:[#allocation14 + $0x10] sm:$0xf]  ;;  %s2259_s22 = sshll.u32 %s776_s16, 4  ;;  %s2260_s22 = int_to_ptr.vmem [resolvable:$true] %s2259_s22 }
 0xa18   : > { %v2919_v45 = vld [vmem:[#allocation14 + $0x14] sm:$0xf0] }
 0xa19   : > { %v2730_v49 = vor.u32 %v2919_v45, %v2729_v44  ;;  %v3086_v45 = vld [vmem:[%s4061_s3] ss:$0 sm:$0xff] }
 0xa1e   : > { %v1787_v46 = vpop.f32.mrf.mxu0 }
 0xa1f   : > { %v2918_v46 = vld [vmem:[#allocation14 + $0x14] sm:$0xf] }
 0xa20   : > { %v2734_v51 = vor.u32 %v2918_v46, %v2731_v48 }
 0xa22   : > { %2073 = vmatpush.bf16.msrb.mxu3 %v2734_v51 }
 0xa6a   : > { %v1795_v58 = vpop.permute.xlu2 %1794 }
 0xa71   : > { %v1791_v56 = vpop.permute.xlu0 %1790 }
 0xa72   : > { %v1801_v47 = vsel %vm986_vm0, %v1620_v25, %v1791_v56  ;;  %v2753_v25 = vld [vmem:[#allocation14 + $0x40] sm:$0xf]  ;;  %v2723_v56 = vld [vmem:[#allocation14 + $0x8] sm:$0xf0] }
 0xa73   : > { %v1802_v29 = vsel %vm1229_vm3, %v1801_v47, %v1795_v58  ;;  %v2754_v28 = vor.u32 %v2925_v26, %v2753_v25  ;;  %v2722_v47 = vor.u32 %v2917_v53, %v2721_v52  ;;  %v2726_v58 = vor.u32 %v2916_v55, %v2723_v56  ;;  %v2933_v25 = vld [vmem:[#allocation16 + $0x8] sm:$0xff] }
 0xa74   : > { %v2941_v26 = vld [vmem:[#allocation16 + $0x48] sm:$0xff] }
 0xa75   : > { %2074 = vmatpush.bf16.msrb.mxu3 %v2726_v58 }
 0xa89   : > { %v1799_v59 = vpop.permute.xlu0 %1798 }
 0xa8a   : > { %v1803_v60 = vsel %vm1231_vm4, %v1802_v29, %v1799_v59  ;;  %v2939_v29 = vld [vmem:[#allocation16 + $0x38] sm:$0xff] }
 0xa8b   : > { %v1804_v61 = vpack.c.bf16 %v1803_v60, %v1803_v60  ;;  %v2947_v60 = vld [vmem:[#allocation16 + $0x78] sm:$0xff]  ;;  %2180 = vmatpush.bf16.msra.mxu0 %v2939_v29 }
 0xa8c   : > { %2193 = vmatpush.bf16.msrb.mxu1 %v2947_v60 }
 0xa8d   : > { %1880 = vmatmul.bf16.vlgmr.msra.gmra.mxu1 %v1804_v61 }
 0xb0a   : > { %v1881_v0 = vpop.f32.mrf.mxu1 }
 0xb0b   : > { %v1882_v1 = vadd.f32 %v3083_v63, %v1881_v0  ;;  %v2938_v63 = vld [vmem:[#allocation16 + $0x30] sm:$0xff] }
 0xb0c   : > { %v2946_v0 = vld [vmem:[#allocation16 + $0x70] sm:$0xff]  ;;  %2181 = vmatpush.bf16.msra.mxu0 %v2938_v63 }
 0xb0d   : > { %v1885_v2 = vadd.f32 %v1882_v1, %v3889_v57  ;;  %v2769_v57 = vld [vmem:[#allocation14 + $0x60] sm:$0xf]  ;;  %2194 = vmatpush.bf16.msrb.mxu1 %v2946_v0 }
 0xb0e   : > { %v2770_v15 = vor.u32 %v2929_v13, %v2769_v57  ;;  %v2935_v57 = vld [vmem:[#allocation16 + $0x18] sm:$0xff] }
 0xb0f   : > { %1888 = vadd.xlane.f32.xlu0 %v1885_v2  ;;  %v2943_v13 = vld [vmem:[#allocation16 + $0x58] sm:$0xff] }
 0xb10   : > { %2055 = vmatpush.bf16.msra.mxu2 %v2770_v15  ;;  %v2934_v15 = vld [vmem:[#allocation16 + $0x10] sm:$0xff] }
 0xb12   : > { %v1883_v3 = vpop.f32.mrf.mxu1 }
 0xb13   : > { %v2937_v3 = vld [vmem:[#allocation16 + $0x28] sm:$0xff] }
 0xb14   : > { %2056 = vmatpush.bf16.msra.mxu2 %v2762_v22  ;;  %2182 = vmatpush.bf16.msra.mxu0 %v2937_v3  ;;  %v3087_v3 = vld [vmem:[%s4062_s9] ss:$0 sm:$0xff] }
 0xb18   : > { %2057 = vmatpush.bf16.msra.mxu2 %v2754_v28  ;;  %2183 = vmatpush.bf16.msra.mxu0 %v2936_v7  ;;  %v2940_v28 = vld [vmem:[#allocation16 + $0x40] sm:$0xff] }
 0xb1c   : > { %2058 = vmatpush.bf16.msra.mxu2 %v2746_v36  ;;  %2184 = vmatpush.bf16.msra.mxu0 %v2935_v57 }
 0xb20   : > { %2059 = vmatpush.bf16.msra.mxu2 %v2738_v42  ;;  %2185 = vmatpush.bf16.msra.mxu0 %v2934_v15 }
 0xb24   : > { %2060 = vmatpush.bf16.msra.mxu2 %v2730_v49  ;;  %2186 = vmatpush.bf16.msra.mxu0 %v2933_v25 }
 0xb28   : > { %2061 = vmatpush.bf16.msra.mxu2 %v2722_v47  ;;  %2187 = vmatpush.bf16.msra.mxu0 %v2932_v27 }
 0xb82   : > { %v1889_v4 = vpop.xlane.xlu0 %1888 }
 0xb83   : > { %v1890_v5 = vmul.f32 %v1889_v4, %v3875_v18  ;;  %v2945_v4 = vld [vmem:[#allocation16 + $0x68] sm:$0xff] }
 0xb84   : > { %2195 = vmatpush.bf16.msrb.mxu1 %v2945_v4 }
 0xb85   : > { %v3934_v6 = vsub.f32 %v1885_v2, %v1890_v5 }
 0xb87   : > { %v1892_v62 = vmul.f32 %v3934_v6, %v3934_v6 }
 0xb88   : > { %2196 = vmatpush.bf16.msrb.mxu1 %v2944_v8 }
 0xb89   : > { %1893 = vadd.xlane.f32.xlu1 %v1892_v62 }
 0xb8c   : > { %2197 = vmatpush.bf16.msrb.mxu1 %v2943_v13 }
 0xb90   : > { %2198 = vmatpush.bf16.msrb.mxu1 %v2942_v16 }
 0xb94   : > { %2199 = vmatpush.bf16.msrb.mxu1 %v2941_v26 }
 0xb98   : > { %2200 = vmatpush.bf16.msrb.mxu1 %v2940_v28 }
 0xbfc   : > { %v1894_v50 = vpop.xlane.xlu1 %1893 }
 0xbfd   : > { %v1895_v54 = vmul.f32 0.007874016, %v1894_v50 }
 0xbff   : > { %3127 = vrsqrt.f32 %v1895_v54  ;;  %vm1903_vm9 = vcmp.eq.f32.partialorder %v1895_v54, inf  ;;  %v1906_v10 = vand.u32 2147483648, %v1895_v54  ;;  %vm1905_vm10 = vcmp.eq.f32.partialorder %v1895_v54, 0.0 }
 0xc05   : > { %v3128_v59 = vpop.eup %3127 }
 0xc06   : > { %v1897_v61 = vmul.f32 %v3128_v59, %v1895_v54 }
 0xc08   : > { %v1898_v1 = vmul.f32 %v3128_v59, %v1897_v61 }
 0xc0a   : > { %v1899_v2 = vmul.f32 0.5, %v1898_v1 }
 0xc0c   : > { %v1900_v5 = vsub.f32 1.5, %v1899_v2 }
 0xc0e   : > { %v1901_v62 = vmul.f32 %v3128_v59, %v1900_v5 }
 0xc10   : > { %v1902_v9 = vmul.f32 %v1901_v62, %v1895_v54  ;;  %v3088_v62 = vld [vmem:[%s4064_s12] ss:$0 sm:$0xff] }
 0xc12   : > { %v1904_v11 = vsel %vm1903_vm9, %v1895_v54, %v1902_v9 }
 0xc13   : > { %v1907_v12 = vsel %vm1905_vm10, %v1906_v10, %v1904_v11 }
 0xc14   : > { %v1908_v14 = vadd.f32 1e-10, %v1907_v12 }
 0xc16   : > { %3129 = vrcp.f32 %v1908_v14 }
 0xc1c   : > { %v3130_v19 = vpop.eup %3129 }
 0xc1d   : > { %v1910_v20 = vmul.f32 %v3130_v19, %v3934_v6  ;;  %v1968_v6 = vld [vmem:[%s4060_s28] sm:$0x3]  ;;  %s2261_s28 = sshll.u32 %s2257_s15, 4  ;;  %s2262_s28 = int_to_ptr.hbm [resolvable:$true] %s2261_s28 }
 0xc1e   : > { %v1970_v30 = vperm.slane %v1968_v6, 0  ;;  %v1971_v31 = vperm.slane %v1968_v6, 1  ;;  %s3419_s20 = sshra.s32 %s2262_s28, 4  ;;  %s3420_s20 = int_to_ptr.hbm [resolvable:$true] %s3419_s20 }
 0xc1f   : > { %v1914_v22 = vmul.f32 %v3084_v17, %v1910_v20  ;;  %s3421_s27 = scalar_lea.hbm %s3420_s20, 8  ;;  %p3426_p7 = scmp.lt.s32.totalorder %s3420_s20, %s4063_s26 }
 0xc20   : > { %p3422_p1 = scmp.ne.s32.totalorder %s3420_s20, %s3421_s27  ;;  %p3427_p9 = scmp.lt.s32.totalorder %s3425_s23, %s3421_s27 }
 0xc21   : > { %v1918_v23 = vadd.f32 %v3085_v21, %v1914_v22 }
 0xc22   : > { %p3423_p3 = pnand %p3422_p1, %p3728_p0  ;;  %p3428_p8 = por %p3427_p9, %p3426_p7 }
 0xc23   : > { %v1919_v24 = vpack.c.bf16 %v1918_v23, %v1918_v23 }
 0xc24   : > { %p3424_p13 = pneg %p3423_p3 }
 0xc25   : > { %2062 = vmatmul.bf16.vlgmr.msra.gmra.mxu2 %v1919_v24  ;;  %2075 = vmatmul.bf16.vlgmr.msrb.gmra.mxu3 %v1919_v24 }
 0xc26   : > { %p3429_p5 = pnand %p3428_p8, %p3424_p13 }
 0xca8   : > { %v2063_v32 = vpop.f32.mrf.mxu2  ;;  %v2076_v33 = vpop.f32.mrf.mxu3 }
 0xca9   : > { %v2064_v34 = vadd.f32 %v2063_v32, %v1970_v30  ;;  %v2077_v35 = vadd.f32 %v2076_v33, %v1971_v31 }
 0xcab   : > { %v2080_v36 = vmax.f32 %v2064_v34, 0.0  ;;  %v2081_v37 = vmax.f32 %v2077_v35, 0.0 }
 0xcad   : > { %v2082_v38 = vpack.c.bf16 %v2080_v36, %v2080_v36  ;;  %v2083_v39 = vpack.c.bf16 %v2081_v37, %v2081_v37 }
 0xcaf   : > { %2188 = vmatmul.bf16.vlgmr.msra.gmra.mxu0 %v2082_v38  ;;  %2201 = vmatmul.bf16.vlgmr.msrb.gmra.mxu1 %v2083_v39 }
 0xcb0   : > { %v2065_v40 = vpop.f32.mrf.mxu2  ;;  %v2078_v41 = vpop.f32.mrf.mxu3 }
 0xd2c   : > { %v2189_v42 = vpop.f32.mrf.mxu0  ;;  %v2202_v43 = vpop.f32.mrf.mxu1 }
 0xd2d   : > { %v2203_v44 = vadd.f32 %v2202_v43, %v2189_v42 }
 0xd2f   : > { %v2206_v46 = vadd.f32 %v2203_v44, %v1918_v23 }
 0xd31   : > { %v2211_v48 = vadd.f32 %v3086_v45, %v2206_v46 }
 0xd33   : > { %2214 = vadd.xlane.f32.xlu2 %v2211_v48 }
 0xd34   : > { %v2191_v49 = vpop.f32.mrf.mxu0  ;;  %v2204_v50 = vpop.f32.mrf.mxu1 }
 0xda6   : > { %v2215_v51 = vpop.xlane.xlu2 %2214 }
 0xda7   : > { %v2216_v52 = vmul.f32 %v2215_v51, %v3875_v18 }
 0xda9   : > { %v2217_v53 = vsub.f32 %v2211_v48, %v2216_v52 }
 0xdab   : > { %v2218_v54 = vmul.f32 %v2217_v53, %v2217_v53 }
 0xdad   : > { %2219 = vadd.xlane.f32.xlu0 %v2218_v54 }
 0xe20   : > { %v2220_v55 = vpop.xlane.xlu0 %2219 }
 0xe21   : > { %v2221_v56 = vmul.f32 0.007874016, %v2220_v55 }
 0xe23   : > { %3131 = vrsqrt.f32 %v2221_v56  ;;  %vm2229_vm11 = vcmp.eq.f32.partialorder %v2221_v56, inf  ;;  %v2232_v0 = vand.u32 2147483648, %v2221_v56  ;;  %vm2231_vm12 = vcmp.eq.f32.partialorder %v2221_v56, 0.0 }
 0xe29   : > { %v3132_v47 = vpop.eup %3131 }
 0xe2a   : > { %v2223_v58 = vmul.f32 %v3132_v47, %v2221_v56 }
 0xe2c   : > { %v2224_v59 = vmul.f32 %v3132_v47, %v2223_v58 }
 0xe2e   : > { %v2225_v29 = vmul.f32 0.5, %v2224_v59 }
 0xe30   : > { %v2226_v60 = vsub.f32 1.5, %v2225_v29 }
 0xe32   : > { %v2227_v61 = vmul.f32 %v3132_v47, %v2226_v60 }
 0xe34   : > { %v2228_v63 = vmul.f32 %v2227_v61, %v2221_v56 }
 0xe36   : > { %v2230_v1 = vsel %vm2229_vm11, %v2221_v56, %v2228_v63 }
 0xe37   : > { %v2233_v18 = vsel %vm2231_vm12, %v2232_v0, %v2230_v1 }
 0xe38   : > { %v2234_v2 = vadd.f32 1e-10, %v2233_v18 }
 0xe3a   : > { %3133 = vrcp.f32 %v2234_v2 }
 0xe40   : > { %v3134_v4 = vpop.eup %3133 }
 0xe41   : > { %v2236_v5 = vmul.f32 %v3134_v4, %v2217_v53 }
 0xe43   : > { %v2240_v7 = vmul.f32 %v3087_v3, %v2236_v5 }
 0xe45   : > { %v2244_v8 = vadd.f32 %v3088_v62, %v2240_v7 }
 0xe47   : > { %2245 = vst [vmem:[%s776_s16] sm:$0xff] %v2244_v8 }
 0xe48   : > { %3432 = shalt.err (!%p3429_p5)
}
 0xe49   : > { %2980 = dma.vmem_to_hbm [thread:$0]  (%p3728_p0), %s2260_s22, 128, %s2262_s28, %s2247_s24  }
 0xe4a PF: > { %s2273_s8 = sand.u32 1, %s3479_s0   ;;  %p4065_p10 = scmp.ge.s32.totalorder %s3491_s21, 2 }
 0xe4b   : > { %s2274_s9 = scalar_lea.sflag [#allocation4], %s2273_s8 }
 0xe4c   : > { %p3012_p11 = pnand %p4065_p10, %p3736_p6 }
 0xe4e   : > { %p3013_p12 = pneg %p3012_p11 }
 0xe50   : > { %3474 = dma.done.wait (%p3013_p12), %s2274_s9, 128  }
 0xe51   : > { %3476 = vsyncadd (%p3013_p12), %s2274_s9, 4294967168  ;;  %s4066_s21 = sld [smem:[#allocation26_spill]]  ;;  %s4069_s0 = smov %s3483_s30 }
 0xe52   : > { %s4067_s11 = sld [smem:[#allocation25_spill]] }
 0xe53   : > { %s4068_s20 = sld [smem:[#allocation27_spill]] }
 0xe57   : > { %p38_p2 = scmp.ge.s32.totalorder %s4066_s21, 4  }
 0xe58   : > { %s4070_s30 = smov %s4067_s11 }
 0xe59   :  { %40 = sbr.rel (!%p38_p2) target bundleno = 27 (0x1b), region = 182 }
 0xe5e   :  { %2280 = vsyncpa [#allocation3], 1 }
 0xe5f   :  { %2282 = vsyncpa [#allocation3 + $0x1], 1 }
 0xe60   :  { %2283 = vsyncpa [#allocation6], 1 }
 0xe61   :  { %2285 = vsyncpa [#allocation6 + $0x1], 1 }
 0xe62   :  { %2286 = vsyncpa [#allocation9], 1 }
 0xe63   :  { %2287 = vsyncpa [#allocation12], 1 }
 0xe64   :  { %2288 = vsyncpa [#allocation15], 1 }
 0xe65   :  { %2289 = vsyncpa [#allocation4], 1 }
 0xe66   :  { %2291 = vsyncpa [#allocation4 + $0x1], 1 }

</bundles_post_ra>
